<compile_context>
chip_gen: v6e
topology: v6e:2x2x1
jax: 0.10.0
libtpu: 0.0.40
codegen_flags: <defaults>
</compile_context>

<pallas_src>
import functools

import jax
import jax.numpy as jnp
from jax.experimental import pallas as pl
from jax.experimental.pallas import tpu as pltpu

BN_EPS = 1e-5
COMPUTE_DTYPE = jnp.bfloat16   # MXU input dtype; accumulation stays f32.


def _round_up(x, m):
    return (x + m - 1) // m * m


def _pick_k_tile(k):
    for t in (512, 256, 128):
        if k % t == 0:
            return t
    return k


# ----------------------------- Pallas kernel --------------------------------


def _gemm_bias_act_kernel(*refs, apply_relu, has_residual):
    """One (tm, tn) output tile, accumulated over the K grid axis.

    Epilogue (last K step): y = acc + bias [+ residual]; optional ReLU.
    """
    if has_residual:
        x_ref, w_ref, bias_ref, res_ref, o_ref, acc_ref = refs
    else:
        x_ref, w_ref, bias_ref, o_ref, acc_ref = refs
        res_ref = None

    @pl.when(pl.program_id(2) == 0)
    def _init():
        acc_ref[...] = jnp.zeros_like(acc_ref)

    acc_ref[...] += jnp.dot(x_ref[...], w_ref[...],
                            preferred_element_type=jnp.float32)

    @pl.when(pl.program_id(2) == pl.num_programs(2) - 1)
    def _finalize():
        y = acc_ref[...] + bias_ref[...]
        if has_residual:
            y = y + res_ref[...]
        if apply_relu:
            y = jnp.maximum(y, 0.0)
        o_ref[...] = y.astype(o_ref.dtype)


def gemm_bias_act(x2d, w2d, bias_row, *, apply_relu, residual=None,
                  out_dtype=jnp.float32):
    """o = act(x2d @ w2d + bias [+ residual]).  K and C must be 128-aligned."""
    M, K = x2d.shape
    K2, C = w2d.shape
    assert K == K2 and K % 128 == 0 and C % 128 == 0

    # Tile choices: lane-dense tn (multiple of 128, 256 preferred for the
    # 2x256x256 MXU on v6e/v7x), sublane-aligned tm, K tiles for pipelining.
    tm = min(256, _round_up(M, 8))
    Mp = _round_up(M, tm)
    tn = 256 if C % 256 == 0 else 128
    tk = _pick_k_tile(K)

    if Mp != M:
        x2d = jnp.pad(x2d, ((0, Mp - M), (0, 0)))
        if residual is not None:
            residual = jnp.pad(residual, ((0, Mp - M), (0, 0)))

    x2d = x2d.astype(COMPUTE_DTYPE)
    w2d = w2d.astype(COMPUTE_DTYPE)
    bias_row = bias_row.astype(jnp.float32).reshape(1, C)

    has_residual = residual is not None
    in_specs = [
        pl.BlockSpec((tm, tk), lambda i, j, k: (i, k)),
        pl.BlockSpec((tk, tn), lambda i, j, k: (k, j)),
        pl.BlockSpec((1, tn), lambda i, j, k: (0, j)),
    ]
    inputs = [x2d, w2d, bias_row]
    if has_residual:
        in_specs.append(pl.BlockSpec((tm, tn), lambda i, j, k: (i, j)))
        inputs.append(residual.astype(jnp.float32))

    kern = functools.partial(_gemm_bias_act_kernel,
                             apply_relu=apply_relu, has_residual=has_residual)
    out = pl.pallas_call(
        kern,
        out_shape=jax.ShapeDtypeStruct((Mp, C), out_dtype),
        grid_spec=pltpu.PrefetchScalarGridSpec(
            num_scalar_prefetch=0,
            grid=(Mp // tm, C // tn, K // tk),
            in_specs=in_specs,
            out_specs=pl.BlockSpec((tm, tn), lambda i, j, k: (i, j)),
            scratch_shapes=[pltpu.VMEM((tm, tn), jnp.float32)],
        ),
        compiler_params=pltpu.CompilerParams(
            dimension_semantics=("parallel", "parallel", "arbitrary"),
            vmem_limit_bytes=32 * 1024 * 1024,
        ),
    )(*inputs)
    return out[:M] if Mp != M else out


# ------------------------------- JAX glue -----------------------------------


def _fold_bn_into_weight(w2d, bn):
    """Fold inference-mode BN scale into the (K, Cout) weight; return bias row."""
    scale = bn["gamma"] / jnp.sqrt(bn["var"] + BN_EPS)
    bias = bn["beta"] - bn["mean"] * scale
    return w2d * scale[None, :], bias


def _pad_last(x, to):
    c = x.shape[-1]
    if c == to:
        return x
    return jnp.pad(x, [(0, 0)] * (x.ndim - 1) + [(0, to - c)])


def conv1x1_bn_act(x_nhwc, w_oihw, bn, stride, apply_relu, cinp, coutp,
                   residual=None, out_dtype=COMPUTE_DTYPE):
    """1x1 conv + folded BN (+residual, +ReLU). x_nhwc channels already padded."""
    if stride > 1:
        # TODO(synk): fold the stride into the GEMM index_map / a manual-DMA
        # path instead of materializing the subsampled activation in HBM.
        x_nhwc = x_nhwc[:, ::stride, ::stride, :]
    N, H, W, _ = x_nhwc.shape
    cout = w_oihw.shape[0]

    w2d = jnp.transpose(w_oihw[:, :, 0, 0], (1, 0))          # (Cin, Cout)
    w2d, bias = _fold_bn_into_weight(w2d, bn)
    w2d = jnp.pad(w2d, ((0, cinp - w2d.shape[0]), (0, coutp - cout)))
    bias = jnp.pad(bias, (0, coutp - cout))

    y = gemm_bias_act(x_nhwc.reshape(N * H * W, cinp), w2d, bias,
                      apply_relu=apply_relu, residual=residual,
                      out_dtype=out_dtype)
    return y.reshape(N, H, W, coutp)


def conv3x3_bn_act(x_nhwc, w_oihw, bn, stride, apply_relu, cinp, coutp,
                   out_dtype=COMPUTE_DTYPE):
    """3x3 conv (pad 1, groups=1) + folded BN + ReLU via im2col GEMM."""
    # TODO(synk): grouped 3x3 conv (num_gs > 1) not implemented.
    # TODO(synk): replace host-side im2col with an in-kernel halo DMA
    # (memory_space=pl.ANY + make_async_copy) to remove the 9x HBM round trip.
    N, H, W, _ = x_nhwc.shape
    cout = w_oihw.shape[0]
    Ho = (H + 2 - 3) // stride + 1
    Wo = (W + 2 - 3) // stride + 1

    xp = jnp.pad(x_nhwc, ((0, 0), (1, 1), (1, 1), (0, 0)))
    cols = []
    for dy in range(3):
        for dx in range(3):
            cols.append(
                xp[:, dy: dy + stride * (Ho - 1) + 1: stride,
                       dx: dx + stride * (Wo - 1) + 1: stride, :])
    patches = jnp.concatenate(cols, axis=-1).reshape(N * Ho * Wo, 9 * cinp)

    # Pad the input-channel axis of the weight first so the K layout matches.
    w_p = jnp.pad(w_oihw, ((0, 0), (0, cinp - w_oihw.shape[1]), (0, 0), (0, 0)))
    w2d = jnp.transpose(w_p, (2, 3, 1, 0)).reshape(9 * cinp, cout)
    w2d, bias = _fold_bn_into_weight(w2d, bn)
    w2d = jnp.pad(w2d, ((0, 0), (0, coutp - cout)))
    bias = jnp.pad(bias, (0, coutp - cout))

    y = gemm_bias_act(patches, w2d, bias, apply_relu=apply_relu,
                      out_dtype=out_dtype)
    return y.reshape(N, Ho, Wo, coutp)


def res_block_forward(params, x_nchw, stride):
    x = jnp.transpose(x_nchw, (0, 2, 3, 1))      # NCHW -> NHWC
    N, H, W, cin = x.shape
    w_b = params["a_w"].shape[0]
    w_out = params["c_w"].shape[0]

    cinp = _round_up(cin, 128)
    cbp = _round_up(w_b, 128)
    coutp = _round_up(w_out, 128)

    # Pad channels once; the padded lanes stay exactly zero through the block.
    xpad = _pad_last(x, cinp).astype(COMPUTE_DTYPE)

    # F(x): bottleneck transform (bf16 intermediates, padded channels).
    a = conv1x1_bn_act(xpad, params["a_w"], params["a_bn"], 1, True, cinp, cbp)
    b = conv3x3_bn_act(a, params["b_w"], params["b_bn"], stride, True, cbp, cbp)

    # Residual branch.
    proj_block = (cin != w_out) or (stride != 1)
    if proj_block:
        # TODO(synk): for stride==1 the 'a' and 'proj' GEMMs could share one
        # read of x by concatenating their weight columns.
        p = conv1x1_bn_act(xpad, params["proj_w"], params["proj_bn"], stride,
                           False, cinp, coutp, out_dtype=jnp.float32)
        residual = p.reshape(-1, coutp)
    else:
        residual = xpad.astype(jnp.float32).reshape(-1, coutp)

    # Final 1x1 conv: BN + residual add + ReLU fused into the GEMM epilogue.
    Nb, Ho, Wo, _ = b.shape
    c = conv1x1_bn_act(b, params["c_w"], params["c_bn"], 1, True, cbp, coutp,
                       residual=residual, out_dtype=jnp.float32)

    out = c[..., :w_out]
    return jnp.transpose(out, (0, 3, 1, 2))      # NHWC -> NCHW


# ----------------------------- reference (jnp) ------------------------------


def _ref_conv(x_nhwc, w_oihw, stride, padding):
    return jax.lax.conv_general_dilated(
        x_nhwc,
        jnp.transpose(w_oihw, (2, 3, 1, 0)),
        window_strides=(stride, stride),
        padding=padding,
        dimension_numbers=("NHWC", "HWIO", "NHWC"),
    )


def _ref_bn(x, bn, relu):
    s = bn["gamma"] / jnp.sqrt(bn["var"] + BN_EPS)
    y = x * s + (bn["beta"] - bn["mean"] * s)
    return jnp.maximum(y, 0.0) if relu else y


def res_block_ref(params, x_nchw, stride):
    x = jnp.transpose(x_nchw, (0, 2, 3, 1))
    a = _ref_bn(_ref_conv(x, params["a_w"], 1, "VALID"), params["a_bn"], True)
    b = _ref_bn(_ref_conv(a, params["b_w"], stride, [(1, 1), (1, 1)]), params["b_bn"], True)
    c = _ref_bn(_ref_conv(b, params["c_w"], 1, "VALID"), params["c_bn"], False)
    p = _ref_bn(_ref_conv(x, params["proj_w"], stride, "VALID"), params["proj_bn"], False)
    out = jnp.maximum(p + c, 0.0)
    return jnp.transpose(out, (0, 3, 1, 2))


# --------------------------------- main --------------------------------------


def init_bn(key, c):
    k1, k2, k3, k4 = jax.random.split(key, 4)
    return {
        "gamma": 1.0 + 0.1 * jax.random.normal(k1, (c,), jnp.float32),
        "beta": 0.1 * jax.random.normal(k2, (c,), jnp.float32),
        "mean": 0.1 * jax.random.normal(k3, (c,), jnp.float32),
        "var": 1.0 + 0.1 * jax.random.uniform(k4, (c,), jnp.float32),
    }


def init_params(key, w_in, w_out, w_b):
    ks = jax.random.split(key, 8)
    sc = 0.2
    return {
        "a_w": sc * jax.random.normal(ks[0], (w_b, w_in, 1, 1), jnp.float32),
        "a_bn": init_bn(ks[1], w_b),
        "b_w": sc * jax.random.normal(ks[2], (w_b, w_b, 3, 3), jnp.float32),
        "b_bn": init_bn(ks[3], w_b),
        "c_w": sc * jax.random.normal(ks[4], (w_out, w_b, 1, 1), jnp.float32),
        "c_bn": init_bn(ks[5], w_out),
        "proj_w": sc * jax.random.normal(ks[6], (w_out, w_in, 1, 1), jnp.float32),
        "proj_bn": init_bn(ks[7], w_out),
    }


if __name__ == "__main__":
    w_in, w_out, w_b, stride = 4, 8, 4, 2
    key = jax.random.PRNGKey(0)
    kx, kp = jax.random.split(key)
    x = jax.random.normal(kx, (2, w_in, 16, 16), jnp.float32)  # NCHW like PyTorch
    params = init_params(kp, w_in, w_out, w_b)

    fwd = jax.jit(res_block_forward, static_argnames=("stride",))
    out = jax.block_until_ready(fwd(params, x, stride=stride))

    ref = jax.block_until_ready(res_block_ref(params, x, stride))
    assert out.shape == (2, w_out, 8, 8), out.shape
    # bf16 MXU inputs -> relaxed tolerance vs. the f32 reference.
    max_err = float(jnp.max(jnp.abs(out - ref)))
    assert jnp.allclose(out, ref, atol=5e-2, rtol=5e-2), max_err

    print("KERNEL_OK")
</pallas_src>

<mosaic_0001>
module attributes {stable_mosaic.version = 11 : i64} {
  func.func @_gemm_bias_act_kernel(%arg0: i32, %arg1: i32, %arg2: i32, %arg3: memref<128x128xbf16, #tpu.memory_space<vmem>>, %arg4: memref<128x128xbf16, #tpu.memory_space<vmem>>, %arg5: memref<1x128xf32, #tpu.memory_space<vmem>>, %arg6: memref<128x128xf32, #tpu.memory_space<vmem>>, %arg7: memref<128x128xf32, #tpu.memory_space<vmem>>) attributes {dimension_semantics = [#tpu.dimension_semantics<parallel>, #tpu.dimension_semantics<parallel>, #tpu.dimension_semantics<arbitrary>], iteration_bounds = array<i64: 1, 1, 1>, scalar_prefetch = 0 : i64, scratch_operands = 1 : i64, tpu.core_type = #tpu.core_type<tc>, window_params = [{transform_indices = @transform_0, window_bounds = array<i64: 128, 128>}, {transform_indices = @transform_1, window_bounds = array<i64: 128, 128>}, {transform_indices = @transform_2, window_bounds = array<i64: 1, 128>}, {transform_indices = @transform_3, window_bounds = array<i64: 128, 128>}]} {
    %c0_i32 = arith.constant 0 : i32
    %0 = arith.cmpi eq, %arg2, %c0_i32 : i32
    %1 = arith.extui %0 : i1 to i32
    %c0_i32_0 = arith.constant 0 : i32
    %2 = arith.cmpi ne, %1, %c0_i32_0 : i32
    scf.if %2 {
      %cst_10 = arith.constant 0.000000e+00 : f32
      %12 = vector.broadcast %cst_10 : f32 to vector<128x128xf32>
      %c0_11 = arith.constant 0 : index
      %c0_12 = arith.constant 0 : index
      %13 = vector.load %arg7[%c0_11, %c0_12] : memref<128x128xf32, #tpu.memory_space<vmem>>, vector<128x128xf32>
      tpu.vector_store %arg7[%c0_11, %c0_12], %12 {strides = array<i32>} : memref<128x128xf32, #tpu.memory_space<vmem>>, vector<128x128xf32>,
    } else {
    }
    %c0 = arith.constant 0 : index
    %c0_1 = arith.constant 0 : index
    %3 = vector.load %arg7[%c0, %c0_1] : memref<128x128xf32, #tpu.memory_space<vmem>>, vector<128x128xf32>
    %c0_2 = arith.constant 0 : index
    %c0_3 = arith.constant 0 : index
    %4 = vector.load %arg3[%c0_2, %c0_3] : memref<128x128xbf16, #tpu.memory_space<vmem>>, vector<128x128xbf16>
    %c0_4 = arith.constant 0 : index
    %c0_5 = arith.constant 0 : index
    %5 = vector.load %arg4[%c0_4, %c0_5] : memref<128x128xbf16, #tpu.memory_space<vmem>>, vector<128x128xbf16>
    %cst = arith.constant dense<0.000000e+00> : vector<128x128xf32>
    %6 = tpu.matmul %4, %5, %cst {dimension_numbers = #tpu.dot_dimension_numbers<[1], [0], [0], [1], [0, 0, 1, 1], [], []>} : vector<128x128xbf16>, vector<128x128xbf16>, vector<128x128xf32> -> vector<128x128xf32>
    %7 = arith.addf %3, %6 : vector<128x128xf32>
    %c0_6 = arith.constant 0 : index
    %c0_7 = arith.constant 0 : index
    %8 = vector.load %arg7[%c0_6, %c0_7] : memref<128x128xf32, #tpu.memory_space<vmem>>, vector<128x128xf32>
    tpu.vector_store %arg7[%c0_6, %c0_7], %7 {strides = array<i32>} : memref<128x128xf32, #tpu.memory_space<vmem>>, vector<128x128xf32>,
    %c0_i32_8 = arith.constant 0 : i32
    %9 = arith.cmpi eq, %arg2, %c0_i32_8 : i32
    %10 = arith.extui %9 : i1 to i32
    %c0_i32_9 = arith.constant 0 : i32
    %11 = arith.cmpi ne, %10, %c0_i32_9 : i32
    scf.if %11 {
      %c0_10 = arith.constant 0 : index
      %c0_11 = arith.constant 0 : index
      %12 = vector.load %arg7[%c0_10, %c0_11] : memref<128x128xf32, #tpu.memory_space<vmem>>, vector<128x128xf32>
      %c0_12 = arith.constant 0 : index
      %c0_13 = arith.constant 0 : index
      %13 = vector.load %arg5[%c0_12, %c0_13] : memref<1x128xf32, #tpu.memory_space<vmem>>, vector<1x128xf32>
      %14 = vector.broadcast %13 : vector<1x128xf32> to vector<128x128xf32>
      %15 = arith.addf %12, %14 : vector<128x128xf32>
      %c0_14 = arith.constant 0 : index
      %c0_15 = arith.constant 0 : index
      %16 = vector.load %arg6[%c0_14, %c0_15] : memref<128x128xf32, #tpu.memory_space<vmem>>, vector<128x128xf32>
      tpu.vector_store %arg6[%c0_14, %c0_15], %15 {strides = array<i32>} : memref<128x128xf32, #tpu.memory_space<vmem>>, vector<128x128xf32>,
    } else {
    }
    return
  }
  func.func @transform_0(%arg0: i32, %arg1: i32, %arg2: i32) -> (i32, i32) {
    %c0_i32 = arith.constant 0 : i32
    return %arg0, %arg2 : i32, i32
  }
  func.func @transform_1(%arg0: i32, %arg1: i32, %arg2: i32) -> (i32, i32) {
    %c0_i32 = arith.constant 0 : i32
    return %arg2, %arg1 : i32, i32
  }
  func.func @transform_2(%arg0: i32, %arg1: i32, %arg2: i32) -> (i32, i32) {
    %c0_i32 = arith.constant 0 : i32
    %c0_i32_0 = arith.constant 0 : i32
    return %c0_i32, %arg1 : i32, i32
  }
  func.func @transform_3(%arg0: i32, %arg1: i32, %arg2: i32) -> (i32, i32) {
    %c0_i32 = arith.constant 0 : i32
    return %arg0, %arg1 : i32, i32
  }
}

module attributes {stable_mosaic.version = 11 : i64} {
  func.func @_gemm_bias_act_kernel(%arg0: i32, %arg1: i32, %arg2: i32, %arg3: memref<256x128xbf16, #tpu.memory_space<vmem>>, %arg4: memref<128x128xbf16, #tpu.memory_space<vmem>>, %arg5: memref<1x128xf32, #tpu.memory_space<vmem>>, %arg6: memref<256x128xbf16, #tpu.memory_space<vmem>>, %arg7: memref<256x128xf32, #tpu.memory_space<vmem>>) attributes {dimension_semantics = [#tpu.dimension_semantics<parallel>, #tpu.dimension_semantics<parallel>, #tpu.dimension_semantics<arbitrary>], iteration_bounds = array<i64: 2, 1, 1>, scalar_prefetch = 0 : i64, scratch_operands = 1 : i64, tpu.core_type = #tpu.core_type<tc>, window_params = [{transform_indices = @transform_0, window_bounds = array<i64: 256, 128>}, {transform_indices = @transform_1, window_bounds = array<i64: 128, 128>}, {transform_indices = @transform_2, window_bounds = array<i64: 1, 128>}, {transform_indices = @transform_3, window_bounds = array<i64: 256, 128>}]} {
    %c0_i32 = arith.constant 0 : i32
    %0 = arith.cmpi eq, %arg2, %c0_i32 : i32
    %1 = arith.extui %0 : i1 to i32
    %c0_i32_0 = arith.constant 0 : i32
    %2 = arith.cmpi ne, %1, %c0_i32_0 : i32
    scf.if %2 {
      %cst_10 = arith.constant 0.000000e+00 : f32
      %12 = vector.broadcast %cst_10 : f32 to vector<256x128xf32>
      %c0_11 = arith.constant 0 : index
      %c0_12 = arith.constant 0 : index
      %13 = vector.load %arg7[%c0_11, %c0_12] : memref<256x128xf32, #tpu.memory_space<vmem>>, vector<256x128xf32>
      tpu.vector_store %arg7[%c0_11, %c0_12], %12 {strides = array<i32>} : memref<256x128xf32, #tpu.memory_space<vmem>>, vector<256x128xf32>,
    } else {
    }
    %c0 = arith.constant 0 : index
    %c0_1 = arith.constant 0 : index
    %3 = vector.load %arg7[%c0, %c0_1] : memref<256x128xf32, #tpu.memory_space<vmem>>, vector<256x128xf32>
    %c0_2 = arith.constant 0 : index
    %c0_3 = arith.constant 0 : index
    %4 = vector.load %arg3[%c0_2, %c0_3] : memref<256x128xbf16, #tpu.memory_space<vmem>>, vector<256x128xbf16>
    %c0_4 = arith.constant 0 : index
    %c0_5 = arith.constant 0 : index
    %5 = vector.load %arg4[%c0_4, %c0_5] : memref<128x128xbf16, #tpu.memory_space<vmem>>, vector<128x128xbf16>
    %cst = arith.constant dense<0.000000e+00> : vector<256x128xf32>
    %6 = tpu.matmul %4, %5, %cst {dimension_numbers = #tpu.dot_dimension_numbers<[1], [0], [0], [1], [0, 0, 1, 1], [], []>} : vector<256x128xbf16>, vector<128x128xbf16>, vector<256x128xf32> -> vector<256x128xf32>
    %7 = arith.addf %3, %6 : vector<256x128xf32>
    %c0_6 = arith.constant 0 : index
    %c0_7 = arith.constant 0 : index
    %8 = vector.load %arg7[%c0_6, %c0_7] : memref<256x128xf32, #tpu.memory_space<vmem>>, vector<256x128xf32>
    tpu.vector_store %arg7[%c0_6, %c0_7], %7 {strides = array<i32>} : memref<256x128xf32, #tpu.memory_space<vmem>>, vector<256x128xf32>,
    %c0_i32_8 = arith.constant 0 : i32
    %9 = arith.cmpi eq, %arg2, %c0_i32_8 : i32
    %10 = arith.extui %9 : i1 to i32
    %c0_i32_9 = arith.constant 0 : i32
    %11 = arith.cmpi ne, %10, %c0_i32_9 : i32
    scf.if %11 {
      %c0_10 = arith.constant 0 : index
      %c0_11 = arith.constant 0 : index
      %12 = vector.load %arg7[%c0_10, %c0_11] : memref<256x128xf32, #tpu.memory_space<vmem>>, vector<256x128xf32>
      %c0_12 = arith.constant 0 : index
      %c0_13 = arith.constant 0 : index
      %13 = vector.load %arg5[%c0_12, %c0_13] : memref<1x128xf32, #tpu.memory_space<vmem>>, vector<1x128xf32>
      %14 = vector.broadcast %13 : vector<1x128xf32> to vector<256x128xf32>
      %15 = arith.addf %12, %14 : vector<256x128xf32>
      %cst_14 = arith.constant 0.000000e+00 : f32
      %16 = vector.broadcast %cst_14 : f32 to vector<256x128xf32>
      %17 = arith.maximumf %15, %16 : vector<256x128xf32>
      %18 = arith.truncf %17 : vector<256x128xf32> to vector<256x128xbf16>
      %c0_15 = arith.constant 0 : index
      %c0_16 = arith.constant 0 : index
      %19 = vector.load %arg6[%c0_15, %c0_16] : memref<256x128xbf16, #tpu.memory_space<vmem>>, vector<256x128xbf16>
      tpu.vector_store %arg6[%c0_15, %c0_16], %18 {strides = array<i32>} : memref<256x128xbf16, #tpu.memory_space<vmem>>, vector<256x128xbf16>,
    } else {
    }
    return
  }
  func.func @transform_0(%arg0: i32, %arg1: i32, %arg2: i32) -> (i32, i32) {
    %c0_i32 = arith.constant 0 : i32
    return %arg0, %arg2 : i32, i32
  }
  func.func @transform_1(%arg0: i32, %arg1: i32, %arg2: i32) -> (i32, i32) {
    %c0_i32 = arith.constant 0 : i32
    return %arg2, %arg1 : i32, i32
  }
  func.func @transform_2(%arg0: i32, %arg1: i32, %arg2: i32) -> (i32, i32) {
    %c0_i32 = arith.constant 0 : i32
    %c0_i32_0 = arith.constant 0 : i32
    return %c0_i32, %arg1 : i32, i32
  }
  func.func @transform_3(%arg0: i32, %arg1: i32, %arg2: i32) -> (i32, i32) {
    %c0_i32 = arith.constant 0 : i32
    return %arg0, %arg1 : i32, i32
  }
}

module attributes {stable_mosaic.version = 11 : i64} {
  func.func @_gemm_bias_act_kernel(%arg0: i32, %arg1: i32, %arg2: i32, %arg3: memref<128x128xbf16, #tpu.memory_space<vmem>>, %arg4: memref<128x128xbf16, #tpu.memory_space<vmem>>, %arg5: memref<1x128xf32, #tpu.memory_space<vmem>>, %arg6: memref<128x128xbf16, #tpu.memory_space<vmem>>, %arg7: memref<128x128xf32, #tpu.memory_space<vmem>>) attributes {dimension_semantics = [#tpu.dimension_semantics<parallel>, #tpu.dimension_semantics<parallel>, #tpu.dimension_semantics<arbitrary>], iteration_bounds = array<i64: 1, 1, 9>, scalar_prefetch = 0 : i64, scratch_operands = 1 : i64, tpu.core_type = #tpu.core_type<tc>, window_params = [{transform_indices = @transform_0, window_bounds = array<i64: 128, 128>}, {transform_indices = @transform_1, window_bounds = array<i64: 128, 128>}, {transform_indices = @transform_2, window_bounds = array<i64: 1, 128>}, {transform_indices = @transform_3, window_bounds = array<i64: 128, 128>}]} {
    %c0_i32 = arith.constant 0 : i32
    %0 = arith.cmpi eq, %arg2, %c0_i32 : i32
    %1 = arith.extui %0 : i1 to i32
    %c0_i32_0 = arith.constant 0 : i32
    %2 = arith.cmpi ne, %1, %c0_i32_0 : i32
    scf.if %2 {
      %cst_9 = arith.constant 0.000000e+00 : f32
      %12 = vector.broadcast %cst_9 : f32 to vector<128x128xf32>
      %c0_10 = arith.constant 0 : index
      %c0_11 = arith.constant 0 : index
      %13 = vector.load %arg7[%c0_10, %c0_11] : memref<128x128xf32, #tpu.memory_space<vmem>>, vector<128x128xf32>
      tpu.vector_store %arg7[%c0_10, %c0_11], %12 {strides = array<i32>} : memref<128x128xf32, #tpu.memory_space<vmem>>, vector<128x128xf32>,
    } else {
    }
    %c0 = arith.constant 0 : index
    %c0_1 = arith.constant 0 : index
    %3 = vector.load %arg7[%c0, %c0_1] : memref<128x128xf32, #tpu.memory_space<vmem>>, vector<128x128xf32>
    %c0_2 = arith.constant 0 : index
    %c0_3 = arith.constant 0 : index
    %4 = vector.load %arg3[%c0_2, %c0_3] : memref<128x128xbf16, #tpu.memory_space<vmem>>, vector<128x128xbf16>
    %c0_4 = arith.constant 0 : index
    %c0_5 = arith.constant 0 : index
    %5 = vector.load %arg4[%c0_4, %c0_5] : memref<128x128xbf16, #tpu.memory_space<vmem>>, vector<128x128xbf16>
    %cst = arith.constant dense<0.000000e+00> : vector<128x128xf32>
    %6 = tpu.matmul %4, %5, %cst {dimension_numbers = #tpu.dot_dimension_numbers<[1], [0], [0], [1], [0, 0, 1, 1], [], []>} : vector<128x128xbf16>, vector<128x128xbf16>, vector<128x128xf32> -> vector<128x128xf32>
    %7 = arith.addf %3, %6 : vector<128x128xf32>
    %c0_6 = arith.constant 0 : index
    %c0_7 = arith.constant 0 : index
    %8 = vector.load %arg7[%c0_6, %c0_7] : memref<128x128xf32, #tpu.memory_space<vmem>>, vector<128x128xf32>
    tpu.vector_store %arg7[%c0_6, %c0_7], %7 {strides = array<i32>} : memref<128x128xf32, #tpu.memory_space<vmem>>, vector<128x128xf32>,
    %c8_i32 = arith.constant 8 : i32
    %9 = arith.cmpi eq, %arg2, %c8_i32 : i32
    %10 = arith.extui %9 : i1 to i32
    %c0_i32_8 = arith.constant 0 : i32
    %11 = arith.cmpi ne, %10, %c0_i32_8 : i32
    scf.if %11 {
      %c0_9 = arith.constant 0 : index
      %c0_10 = arith.constant 0 : index
      %12 = vector.load %arg7[%c0_9, %c0_10] : memref<128x128xf32, #tpu.memory_space<vmem>>, vector<128x128xf32>
      %c0_11 = arith.constant 0 : index
      %c0_12 = arith.constant 0 : index
      %13 = vector.load %arg5[%c0_11, %c0_12] : memref<1x128xf32, #tpu.memory_space<vmem>>, vector<1x128xf32>
      %14 = vector.broadcast %13 : vector<1x128xf32> to vector<128x128xf32>
      %15 = arith.addf %12, %14 : vector<128x128xf32>
      %cst_13 = arith.constant 0.000000e+00 : f32
      %16 = vector.broadcast %cst_13 : f32 to vector<128x128xf32>
      %17 = arith.maximumf %15, %16 : vector<128x128xf32>
      %18 = arith.truncf %17 : vector<128x128xf32> to vector<128x128xbf16>
      %c0_14 = arith.constant 0 : index
      %c0_15 = arith.constant 0 : index
      %19 = vector.load %arg6[%c0_14, %c0_15] : memref<128x128xbf16, #tpu.memory_space<vmem>>, vector<128x128xbf16>
      tpu.vector_store %arg6[%c0_14, %c0_15], %18 {strides = array<i32>} : memref<128x128xbf16, #tpu.memory_space<vmem>>, vector<128x128xbf16>,
    } else {
    }
    return
  }
  func.func @transform_0(%arg0: i32, %arg1: i32, %arg2: i32) -> (i32, i32) {
    %c0_i32 = arith.constant 0 : i32
    return %arg0, %arg2 : i32, i32
  }
  func.func @transform_1(%arg0: i32, %arg1: i32, %arg2: i32) -> (i32, i32) {
    %c0_i32 = arith.constant 0 : i32
    return %arg2, %arg1 : i32, i32
  }
  func.func @transform_2(%arg0: i32, %arg1: i32, %arg2: i32) -> (i32, i32) {
    %c0_i32 = arith.constant 0 : i32
    %c0_i32_0 = arith.constant 0 : i32
    return %c0_i32, %arg1 : i32, i32
  }
  func.func @transform_3(%arg0: i32, %arg1: i32, %arg2: i32) -> (i32, i32) {
    %c0_i32 = arith.constant 0 : i32
    return %arg0, %arg1 : i32, i32
  }
}

module attributes {stable_mosaic.version = 11 : i64} {
  func.func @_gemm_bias_act_kernel(%arg0: i32, %arg1: i32, %arg2: i32, %arg3: memref<128x128xbf16, #tpu.memory_space<vmem>>, %arg4: memref<128x128xbf16, #tpu.memory_space<vmem>>, %arg5: memref<1x128xf32, #tpu.memory_space<vmem>>, %arg6: memref<128x128xf32, #tpu.memory_space<vmem>>, %arg7: memref<128x128xf32, #tpu.memory_space<vmem>>, %arg8: memref<128x128xf32, #tpu.memory_space<vmem>>) attributes {dimension_semantics = [#tpu.dimension_semantics<parallel>, #tpu.dimension_semantics<parallel>, #tpu.dimension_semantics<arbitrary>], iteration_bounds = array<i64: 1, 1, 1>, scalar_prefetch = 0 : i64, scratch_operands = 1 : i64, tpu.core_type = #tpu.core_type<tc>, window_params = [{transform_indices = @transform_0, window_bounds = array<i64: 128, 128>}, {transform_indices = @transform_1, window_bounds = array<i64: 128, 128>}, {transform_indices = @transform_2, window_bounds = array<i64: 1, 128>}, {transform_indices = @transform_3, window_bounds = array<i64: 128, 128>}, {transform_indices = @transform_4, window_bounds = array<i64: 128, 128>}]} {
    %c0_i32 = arith.constant 0 : i32
    %0 = arith.cmpi eq, %arg2, %c0_i32 : i32
    %1 = arith.extui %0 : i1 to i32
    %c0_i32_0 = arith.constant 0 : i32
    %2 = arith.cmpi ne, %1, %c0_i32_0 : i32
    scf.if %2 {
      %cst_10 = arith.constant 0.000000e+00 : f32
      %12 = vector.broadcast %cst_10 : f32 to vector<128x128xf32>
      %c0_11 = arith.constant 0 : index
      %c0_12 = arith.constant 0 : index
      %13 = vector.load %arg8[%c0_11, %c0_12] : memref<128x128xf32, #tpu.memory_space<vmem>>, vector<128x128xf32>
      tpu.vector_store %arg8[%c0_11, %c0_12], %12 {strides = array<i32>} : memref<128x128xf32, #tpu.memory_space<vmem>>, vector<128x128xf32>,
    } else {
    }
    %c0 = arith.constant 0 : index
    %c0_1 = arith.constant 0 : index
    %3 = vector.load %arg8[%c0, %c0_1] : memref<128x128xf32, #tpu.memory_space<vmem>>, vector<128x128xf32>
    %c0_2 = arith.constant 0 : index
    %c0_3 = arith.constant 0 : index
    %4 = vector.load %arg3[%c0_2, %c0_3] : memref<128x128xbf16, #tpu.memory_space<vmem>>, vector<128x128xbf16>
    %c0_4 = arith.constant 0 : index
    %c0_5 = arith.constant 0 : index
    %5 = vector.load %arg4[%c0_4, %c0_5] : memref<128x128xbf16, #tpu.memory_space<vmem>>, vector<128x128xbf16>
    %cst = arith.constant dense<0.000000e+00> : vector<128x128xf32>
    %6 = tpu.matmul %4, %5, %cst {dimension_numbers = #tpu.dot_dimension_numbers<[1], [0], [0], [1], [0, 0, 1, 1], [], []>} : vector<128x128xbf16>, vector<128x128xbf16>, vector<128x128xf32> -> vector<128x128xf32>
    %7 = arith.addf %3, %6 : vector<128x128xf32>
    %c0_6 = arith.constant 0 : index
    %c0_7 = arith.constant 0 : index
    %8 = vector.load %arg8[%c0_6, %c0_7] : memref<128x128xf32, #tpu.memory_space<vmem>>, vector<128x128xf32>
    tpu.vector_store %arg8[%c0_6, %c0_7], %7 {strides = array<i32>} : memref<128x128xf32, #tpu.memory_space<vmem>>, vector<128x128xf32>,
    %c0_i32_8 = arith.constant 0 : i32
    %9 = arith.cmpi eq, %arg2, %c0_i32_8 : i32
    %10 = arith.extui %9 : i1 to i32
    %c0_i32_9 = arith.constant 0 : i32
    %11 = arith.cmpi ne, %10, %c0_i32_9 : i32
    scf.if %11 {
      %c0_10 = arith.constant 0 : index
      %c0_11 = arith.constant 0 : index
      %12 = vector.load %arg8[%c0_10, %c0_11] : memref<128x128xf32, #tpu.memory_space<vmem>>, vector<128x128xf32>
      %c0_12 = arith.constant 0 : index
      %c0_13 = arith.constant 0 : index
      %13 = vector.load %arg5[%c0_12, %c0_13] : memref<1x128xf32, #tpu.memory_space<vmem>>, vector<1x128xf32>
      %14 = vector.broadcast %13 : vector<1x128xf32> to vector<128x128xf32>
      %15 = arith.addf %12, %14 : vector<128x128xf32>
      %c0_14 = arith.constant 0 : index
      %c0_15 = arith.constant 0 : index
      %16 = vector.load %arg6[%c0_14, %c0_15] : memref<128x128xf32, #tpu.memory_space<vmem>>, vector<128x128xf32>
      %17 = arith.addf %15, %16 : vector<128x128xf32>
      %cst_16 = arith.constant 0.000000e+00 : f32
      %18 = vector.broadcast %cst_16 : f32 to vector<128x128xf32>
      %19 = arith.maximumf %17, %18 : vector<128x128xf32>
      %c0_17 = arith.constant 0 : index
      %c0_18 = arith.constant 0 : index
      %20 = vector.load %arg7[%c0_17, %c0_18] : memref<128x128xf32, #tpu.memory_space<vmem>>, vector<128x128xf32>
      tpu.vector_store %arg7[%c0_17, %c0_18], %19 {strides = array<i32>} : memref<128x128xf32, #tpu.memory_space<vmem>>, vector<128x128xf32>,
    } else {
    }
    return
  }
  func.func @transform_0(%arg0: i32, %arg1: i32, %arg2: i32) -> (i32, i32) {
    %c0_i32 = arith.constant 0 : i32
    return %arg0, %arg2 : i32, i32
  }
  func.func @transform_1(%arg0: i32, %arg1: i32, %arg2: i32) -> (i32, i32) {
    %c0_i32 = arith.constant 0 : i32
    return %arg2, %arg1 : i32, i32
  }
  func.func @transform_2(%arg0: i32, %arg1: i32, %arg2: i32) -> (i32, i32) {
    %c0_i32 = arith.constant 0 : i32
    %c0_i32_0 = arith.constant 0 : i32
    return %c0_i32, %arg1 : i32, i32
  }
  func.func @transform_3(%arg0: i32, %arg1: i32, %arg2: i32) -> (i32, i32) {
    %c0_i32 = arith.constant 0 : i32
    return %arg0, %arg1 : i32, i32
  }
  func.func @transform_4(%arg0: i32, %arg1: i32, %arg2: i32) -> (i32, i32) {
    %c0_i32 = arith.constant 0 : i32
    return %arg0, %arg1 : i32, i32
  }
}

</mosaic_0001>

<bundles_post_ra>
// kernel: res_block_forward.6
= control target key start
LH: loop header
LB: loop body
LE: loop exit
PB: predicated region body
PF: predicated region fallthrough
CT: control target
= control target key end

     0   :  { %s586_s1 = inlined_call_operand.vmem [shape: bf16[128,128], index: 1, kind: input, shape index: {}]   ;;  %s587_s0 = inlined_call_operand.vmem [shape: bf16[128,128], index: 0, kind: input, shape index: {}]   ;;  %s588_s2 = inlined_call_operand.vmem [shape: f32[1,128], index: 2, kind: input, shape index: {}]   ;;  %s589_s3 = inlined_call_operand.vmem [shape: f32[128,128], index: 3, kind: output, shape index: {}]  }
   0x1   :  { %v451_v0 = vld [vmem:[%s586_s1 + $0x38] sm:$0xff]   ;;  %v452_v1 = vld [vmem:[%s586_s1 + $0x30] sm:$0xff]   ;;  %v453_v2 = vld [vmem:[%s586_s1 + $0x28] sm:$0xff]  }
   0x2   :  { %403 = vmatprep.subr.bf16.mxu0 %v451_v0  ;;  %435 = vmatprep.subr.bf16.mxu1 %v451_v0  ;;  %v454_v3 = vld [vmem:[%s586_s1 + $0x20] sm:$0xff]   ;;  %v455_v6 = vld [vmem:[%s586_s1 + $0x18] sm:$0xff]   ;;  %v456_v7 = vld [vmem:[%s586_s1 + $0x10] sm:$0xff]  }
   0x3   :  { %404 = vmatpush3.bf16.msra.mxu0 %v451_v0  ;;  %443 = vmatpush3.bf16.msra.mxu1 %v451_v0  ;;  %v459_v4 = vld [vmem:[%s587_s0] sm:$0xff]   ;;  %v457_v8 = vld [vmem:[%s586_s1 + $0x8] sm:$0xff]   ;;  %v463_v12 = vld [vmem:[%s587_s0 + $0x10] sm:$0xff]  }
   0x4   :  { %405 = vmatprep.subr.bf16.mxu0 %v452_v1  ;;  %436 = vmatprep.subr.bf16.mxu1 %v452_v1  ;;  %v460_v5 = vld [vmem:[%s587_s0 + $0x20] sm:$0xff]   ;;  %v461_v10 = vld [vmem:[%s587_s0 + $0x8] sm:$0xff]   ;;  %v464_v13 = vld [vmem:[%s587_s0 + $0x30] sm:$0xff]  }
   0x5   :  { %419 = vmatprep.mubr.bf16.mxu0 %v459_v4  ;;  %427 = vmatprep.mubr.bf16.mxu1 %v460_v5  ;;  %v458_v9 = vld [vmem:[%s586_s1] sm:$0xff]   ;;  %v462_v11 = vld [vmem:[%s587_s0 + $0x28] sm:$0xff]   ;;  %v465_v14 = vld [vmem:[%s587_s0 + $0x18] sm:$0xff]  }
   0x6   :  { %v466_v15 = vld [vmem:[%s587_s0 + $0x38] sm:$0xff]   ;;  %v386_v16 = vld [vmem:[%s588_s2] ss:$0 sm:$0xff] }
   0x7   :  { %406 = vmatpush3.bf16.msra.mxu0 %v452_v1  ;;  %444 = vmatpush3.bf16.msra.mxu1 %v452_v1 }
   0x8   :  { %407 = vmatprep.subr.bf16.mxu0 %v453_v2  ;;  %437 = vmatprep.subr.bf16.mxu1 %v453_v2 }
   0xb   :  { %408 = vmatpush3.bf16.msra.mxu0 %v453_v2  ;;  %445 = vmatpush3.bf16.msra.mxu1 %v453_v2 }
   0xc   :  { %409 = vmatprep.subr.bf16.mxu0 %v454_v3  ;;  %438 = vmatprep.subr.bf16.mxu1 %v454_v3 }
   0xf   :  { %410 = vmatpush3.bf16.msra.mxu0 %v454_v3  ;;  %446 = vmatpush3.bf16.msra.mxu1 %v454_v3 }
  0x10   :  { %411 = vmatprep.subr.bf16.mxu0 %v455_v6  ;;  %439 = vmatprep.subr.bf16.mxu1 %v455_v6 }
  0x13   :  { %412 = vmatpush3.bf16.msra.mxu0 %v455_v6  ;;  %447 = vmatpush3.bf16.msra.mxu1 %v455_v6 }
  0x14   :  { %413 = vmatprep.subr.bf16.mxu0 %v456_v7  ;;  %440 = vmatprep.subr.bf16.mxu1 %v456_v7 }
  0x17   :  { %414 = vmatpush3.bf16.msra.mxu0 %v456_v7  ;;  %448 = vmatpush3.bf16.msra.mxu1 %v456_v7 }
  0x18   :  { %415 = vmatprep.subr.bf16.mxu0 %v457_v8  ;;  %441 = vmatprep.subr.bf16.mxu1 %v457_v8 }
  0x1b   :  { %416 = vmatpush3.bf16.msra.mxu0 %v457_v8  ;;  %449 = vmatpush3.bf16.msra.mxu1 %v457_v8 }
  0x1c   :  { %417 = vmatprep.subr.bf16.mxu0 %v458_v9  ;;  %442 = vmatprep.subr.bf16.mxu1 %v458_v9 }
  0x1f   :  { %418 = vmatpush3.bf16.msra.mxu0 %v458_v9  ;;  %450 = vmatpush3.bf16.msra.mxu1 %v458_v9 }
  0x22   :  { %420 = vmatmul.mubr.bf16.vlgmr.msra.gmra.mxu0 %v461_v10  ;;  %428 = vmatmul.mubr.bf16.vlgmr.msra.gmra.mxu1 %v462_v11 }
  0x23   :  { %423 = vmatprep.mubr.bf16.mxu0 %v463_v12  ;;  %431 = vmatprep.mubr.bf16.mxu1 %v464_v13 }
  0x2a   :  { %424 = vmatmul.mubr.bf16.gmra.mxu0 %v465_v14  ;;  %432 = vmatmul.mubr.bf16.gmra.mxu1 %v466_v15 }
  0xe2   :  { %v421_v17 = vpop.f32.mrf.mxu0  ;;  %v429_v18 = vpop.f32.mrf.mxu1 }
  0xe3   :  { %v336_v19 = vadd.f32 %v421_v17, %v386_v16  ;;  %v344_v20 = vadd.f32 %v429_v18, %v386_v16 }
  0xe4   :  { %v213_v21 = vpop.f32.mrf.mxu0  ;;  %v245_v22 = vpop.f32.mrf.mxu1 }
  0xe5   :  { %352 = vst [vmem:[%s589_s3 + $0x10] sm:$0xff] %v336_v19  ;;  %360 = vst [vmem:[%s589_s3 + $0x50] sm:$0xff] %v344_v20  ;;  %v334_v23 = vadd.f32 %v386_v16, %v213_v21  ;;  %v342_v24 = vadd.f32 %v386_v16, %v245_v22 }
  0xe6   :  { %v422_v25 = vpop.f32.mrf.mxu0  ;;  %v430_v26 = vpop.f32.mrf.mxu1 }
  0xe7   :  { %350 = vst [vmem:[%s589_s3] sm:$0xff] %v334_v23  ;;  %358 = vst [vmem:[%s589_s3 + $0x40] sm:$0xff] %v342_v24  ;;  %v337_v27 = vadd.f32 %v422_v25, %v386_v16  ;;  %v345_v28 = vadd.f32 %v430_v26, %v386_v16 }
  0xe8   :  { %v216_v29 = vpop.f32.mrf.mxu0  ;;  %v248_v30 = vpop.f32.mrf.mxu1 }
  0xe9   :  { %353 = vst [vmem:[%s589_s3 + $0x18] sm:$0xff] %v337_v27  ;;  %361 = vst [vmem:[%s589_s3 + $0x58] sm:$0xff] %v345_v28  ;;  %v335_v31 = vadd.f32 %v386_v16, %v216_v29  ;;  %v343_v32 = vadd.f32 %v386_v16, %v248_v30 }
  0xea   :  { %v425_v33 = vpop.f32.mrf.mxu0  ;;  %v433_v34 = vpop.f32.mrf.mxu1 }
  0xeb   :  { %351 = vst [vmem:[%s589_s3 + $0x8] sm:$0xff] %v335_v31  ;;  %359 = vst [vmem:[%s589_s3 + $0x48] sm:$0xff] %v343_v32  ;;  %v340_v35 = vadd.f32 %v425_v33, %v386_v16  ;;  %v348_v36 = vadd.f32 %v433_v34, %v386_v16 }
  0xec   :  { %v229_v37 = vpop.f32.mrf.mxu0  ;;  %v261_v38 = vpop.f32.mrf.mxu1 }
  0xed   :  { %356 = vst [vmem:[%s589_s3 + $0x30] sm:$0xff] %v340_v35  ;;  %364 = vst [vmem:[%s589_s3 + $0x70] sm:$0xff] %v348_v36  ;;  %v338_v39 = vadd.f32 %v386_v16, %v229_v37  ;;  %v346_v40 = vadd.f32 %v386_v16, %v261_v38 }
  0xee   :  { %v426_v41 = vpop.f32.mrf.mxu0  ;;  %v434_v42 = vpop.f32.mrf.mxu1 }
  0xef   :  { %354 = vst [vmem:[%s589_s3 + $0x20] sm:$0xff] %v338_v39  ;;  %362 = vst [vmem:[%s589_s3 + $0x60] sm:$0xff] %v346_v40  ;;  %v341_v43 = vadd.f32 %v426_v41, %v386_v16  ;;  %v349_v44 = vadd.f32 %v434_v42, %v386_v16 }
  0xf0   :  { %v232_v45 = vpop.f32.mrf.mxu0  ;;  %v264_v46 = vpop.f32.mrf.mxu1 }
  0xf1   :  { %357 = vst [vmem:[%s589_s3 + $0x38] sm:$0xff] %v341_v43  ;;  %365 = vst [vmem:[%s589_s3 + $0x78] sm:$0xff] %v349_v44  ;;  %v339_v47 = vadd.f32 %v386_v16, %v232_v45  ;;  %v347_v48 = vadd.f32 %v386_v16, %v264_v46 }
  0xf3   :  { %355 = vst [vmem:[%s589_s3 + $0x28] sm:$0xff] %v339_v47  ;;  %363 = vst [vmem:[%s589_s3 + $0x68] sm:$0xff] %v347_v48 }

// kernel: res_block_forward.4
= control target key start
LH: loop header
LB: loop body
LE: loop exit
PB: predicated region body
PF: predicated region fallthrough
CT: control target
= control target key end

     0   :  { %s1499_s12 = smov 0   ;;  %s1501_s13 = smov 0   ;;  %s1636_s0 = inlined_call_operand.vmem [shape: bf16[512,128], index: 0, kind: input, shape index: {}]   ;;  %s1637_s1 = inlined_call_operand.vmem [shape: bf16[128,128], index: 1, kind: input, shape index: {}]   ;;  %s1638_s2 = inlined_call_operand.vmem [shape: f32[1,128], index: 2, kind: input, shape index: {}]   ;;  %s1639_s3 = inlined_call_operand.vmem [shape: bf16[512,128], index: 3, kind: output, shape index: {}]  }
   0x1   :  { %s1503_s14 = smov 0  }
   0x2 LB: > { %s32_s15 = sadd.s32 1, %s1473_s13  ;;  %p1128_p0 = scmp.ge.s32.totalorder %s1477_s14, 1  ;;  %s1477_s14 = sphi %s1503_s14, %s13_s14   ;;  %s1473_s13 = sphi %s1501_s13, %s1641_s13   ;;  %s1469_s12 = sphi %s1499_s12, %s1640_s12  }
   0x3   : > { %p34_p1 = scmp.ge.s32.totalorder %s32_s15, 2  ;;  %p188_p2 = scmp.lt.s32.totalorder %s1477_s14, 3 }
   0x5   : > { %s1643_s15 = smov (%p34_p1, %s32_s15), 0  ;;  %p189_p3 = pnand %p1128_p0, %p188_p2 }
   0x6   : > { %s1129_s18 = sshll.u32 (!%p189_p3), %s1469_s12, 5 }
   0x7   : > { %192 = sbr.rel (%p189_p3) target bundleno = 275 (0x113), region = 32  ;;  %p230_p4 = scmp.lt.s32.totalorder (!%p189_p3), %s1129_s18, 63 }
   0xc   : > { %v1431_v0 = vld [vmem:[%s1637_s1 + $0x38] sm:$0xff]   ;;  %v1432_v1 = vld [vmem:[%s1637_s1 + $0x30] sm:$0xff]   ;;  %s1645_s18 = smov (!%p230_p4, %s1129_s18), 63  ;;  %v1433_v2 = vld [vmem:[%s1637_s1 + $0x28] sm:$0xff]  }
   0xd   : > { %1343 = vmatprep.subr.bf16.mxu0 %v1431_v0  ;;  %1391 = vmatprep.subr.bf16.mxu1 %v1431_v0  ;;  %s1130_s23 = sshll.u32 %s1645_s18, 2  ;;  %v1434_v3 = vld [vmem:[%s1637_s1 + $0x20] sm:$0xff]   ;;  %v1435_v6 = vld [vmem:[%s1637_s1 + $0x18] sm:$0xff]   ;;  %v1436_v7 = vld [vmem:[%s1637_s1 + $0x10] sm:$0xff]  }
   0xe   : > { %1344 = vmatpush3.bf16.msra.mxu0 %v1431_v0  ;;  %1399 = vmatpush3.bf16.msra.mxu1 %v1431_v0  ;;  %s1534_s26 = scalar_lea.vmem %s1636_s0, %s1130_s23  ;;  %v1437_v8 = vld [vmem:[%s1637_s1 + $0x8] sm:$0xff]   ;;  %v1438_v9 = vld [vmem:[%s1637_s1] sm:$0xff]   ;;  %s1585_s17 = scalar_lea.vmem %s1639_s3, %s1130_s23 }
   0xf   : > { %1345 = vmatprep.subr.bf16.mxu0 %v1432_v1  ;;  %1392 = vmatprep.subr.bf16.mxu1 %v1432_v1  ;;  %v1439_v4 = vld [vmem:[%s1534_s26] sm:$0xff]   ;;  %v1441_v10 = vld [vmem:[%s1534_s26 + $0x8] sm:$0xff]   ;;  %v1443_v12 = vld [vmem:[%s1534_s26 + $0x10] sm:$0xff]  }
  0x10   : > { %v1440_v5 = vld [vmem:[%s1534_s26 + $0x40] sm:$0xff]   ;;  %1359 = vmatprep.mubr.bf16.mxu0 %v1439_v4  ;;  %v1442_v11 = vld [vmem:[%s1534_s26 + $0x48] sm:$0xff]   ;;  %v1444_v13 = vld [vmem:[%s1534_s26 + $0x50] sm:$0xff]  }
  0x11   : > { %1375 = vmatprep.mubr.bf16.mxu1 %v1440_v5  ;;  %v1445_v14 = vld [vmem:[%s1534_s26 + $0x18] sm:$0xff]   ;;  %v1447_v16 = vld [vmem:[%s1534_s26 + $0x20] sm:$0xff]   ;;  %v1449_v18 = vld [vmem:[%s1534_s26 + $0x28] sm:$0xff]  }
  0x12   : > { %1346 = vmatpush3.bf16.msra.mxu0 %v1432_v1  ;;  %1400 = vmatpush3.bf16.msra.mxu1 %v1432_v1  ;;  %v1446_v15 = vld [vmem:[%s1534_s26 + $0x58] sm:$0xff]   ;;  %v1448_v17 = vld [vmem:[%s1534_s26 + $0x60] sm:$0xff]   ;;  %v1450_v19 = vld [vmem:[%s1534_s26 + $0x68] sm:$0xff]  }
  0x13   : > { %1347 = vmatprep.subr.bf16.mxu0 %v1433_v2  ;;  %1393 = vmatprep.subr.bf16.mxu1 %v1433_v2  ;;  %v1451_v20 = vld [vmem:[%s1534_s26 + $0x30] sm:$0xff]   ;;  %v1453_v22 = vld [vmem:[%s1534_s26 + $0x38] sm:$0xff]   ;;  %v1570_v24 = vld [vmem:[%s1638_s2] ss:$0 sm:$0xff] }
  0x14   : > { %v1452_v21 = vld [vmem:[%s1534_s26 + $0x70] sm:$0xff]   ;;  %v1454_v23 = vld [vmem:[%s1534_s26 + $0x78] sm:$0xff]  }
  0x16   : > { %1348 = vmatpush3.bf16.msra.mxu0 %v1433_v2  ;;  %1401 = vmatpush3.bf16.msra.mxu1 %v1433_v2 }
  0x17   : > { %1349 = vmatprep.subr.bf16.mxu0 %v1434_v3  ;;  %1394 = vmatprep.subr.bf16.mxu1 %v1434_v3 }
  0x1a   : > { %1350 = vmatpush3.bf16.msra.mxu0 %v1434_v3  ;;  %1402 = vmatpush3.bf16.msra.mxu1 %v1434_v3 }
  0x1b   : > { %1351 = vmatprep.subr.bf16.mxu0 %v1435_v6  ;;  %1395 = vmatprep.subr.bf16.mxu1 %v1435_v6 }
  0x1e   : > { %1352 = vmatpush3.bf16.msra.mxu0 %v1435_v6  ;;  %1403 = vmatpush3.bf16.msra.mxu1 %v1435_v6 }
  0x1f   : > { %1353 = vmatprep.subr.bf16.mxu0 %v1436_v7  ;;  %1396 = vmatprep.subr.bf16.mxu1 %v1436_v7 }
  0x22   : > { %1354 = vmatpush3.bf16.msra.mxu0 %v1436_v7  ;;  %1404 = vmatpush3.bf16.msra.mxu1 %v1436_v7 }
  0x23   : > { %1355 = vmatprep.subr.bf16.mxu0 %v1437_v8  ;;  %1397 = vmatprep.subr.bf16.mxu1 %v1437_v8 }
  0x26   : > { %1356 = vmatpush3.bf16.msra.mxu0 %v1437_v8  ;;  %1405 = vmatpush3.bf16.msra.mxu1 %v1437_v8 }
  0x27   : > { %1357 = vmatprep.subr.bf16.mxu0 %v1438_v9  ;;  %1398 = vmatprep.subr.bf16.mxu1 %v1438_v9 }
  0x2a   : > { %1358 = vmatpush3.bf16.msra.mxu0 %v1438_v9  ;;  %1406 = vmatpush3.bf16.msra.mxu1 %v1438_v9 }
  0x2d   : > { %1360 = vmatmul.mubr.bf16.vlgmr.msra.gmra.mxu0 %v1441_v10  ;;  %1376 = vmatmul.mubr.bf16.vlgmr.msra.gmra.mxu1 %v1442_v11 }
  0x2e   : > { %1363 = vmatprep.mubr.bf16.mxu0 %v1443_v12  ;;  %1379 = vmatprep.mubr.bf16.mxu1 %v1444_v13 }
  0x35   : > { %1364 = vmatmul.mubr.bf16.gmra.mxu0 %v1445_v14  ;;  %1380 = vmatmul.mubr.bf16.gmra.mxu1 %v1446_v15 }
  0x36   : > { %1367 = vmatprep.mubr.bf16.mxu0 %v1447_v16  ;;  %1383 = vmatprep.mubr.bf16.mxu1 %v1448_v17 }
  0x3d   : > { %1368 = vmatmul.mubr.bf16.gmra.mxu0 %v1449_v18  ;;  %1384 = vmatmul.mubr.bf16.gmra.mxu1 %v1450_v19 }
  0x3e   : > { %1371 = vmatprep.mubr.bf16.mxu0 %v1451_v20  ;;  %1387 = vmatprep.mubr.bf16.mxu1 %v1452_v21 }
  0x45   : > { %1372 = vmatmul.mubr.bf16.gmra.mxu0 %v1453_v22  ;;  %1388 = vmatmul.mubr.bf16.gmra.mxu1 %v1454_v23 }
  0xed   : > { %v1361_v25 = vpop.f32.mrf.mxu0  ;;  %v1377_v26 = vpop.f32.mrf.mxu1 }
  0xee   : > { %v789_v27 = vadd.f32 %v1361_v25, %v1570_v24  ;;  %v805_v28 = vadd.f32 %v1377_v26, %v1570_v24 }
  0xef   : > { %v554_v29 = vpop.f32.mrf.mxu0  ;;  %v618_v30 = vpop.f32.mrf.mxu1 }
  0xf0   : > { %v787_v31 = vadd.f32 %v1570_v24, %v554_v29  ;;  %v803_v32 = vadd.f32 %v1570_v24, %v618_v30  ;;  %v821_v37 = vmax.f32 %v789_v27, 0.0  ;;  %v837_v38 = vmax.f32 %v805_v28, 0.0 }
  0xf1   : > { %v1362_v33 = vpop.f32.mrf.mxu0  ;;  %v1378_v34 = vpop.f32.mrf.mxu1 }
  0xf2   : > { %v790_v35 = vadd.f32 %v1362_v33, %v1570_v24  ;;  %v806_v36 = vadd.f32 %v1378_v34, %v1570_v24  ;;  %v819_v45 = vmax.f32 %v787_v31, 0.0  ;;  %v835_v46 = vmax.f32 %v803_v32, 0.0 }
  0xf3   : > { %v557_v39 = vpop.f32.mrf.mxu0  ;;  %v621_v40 = vpop.f32.mrf.mxu1 }
  0xf4   : > { %v822_v41 = vmax.f32 %v790_v35, 0.0  ;;  %v838_v42 = vmax.f32 %v806_v36, 0.0  ;;  %v788_v43 = vadd.f32 %v1570_v24, %v557_v39  ;;  %v804_v44 = vadd.f32 %v1570_v24, %v621_v40 }
  0xf5   : > { %v1365_v47 = vpop.f32.mrf.mxu0  ;;  %v1381_v48 = vpop.f32.mrf.mxu1 }
  0xf6   : > { %v1232_v49 = vpack.c.bf16 %v822_v41, %v821_v37  ;;  %v1272_v50 = vpack.c.bf16 %v838_v42, %v837_v38  ;;  %v820_v51 = vmax.f32 %v788_v43, 0.0  ;;  %v836_v52 = vmax.f32 %v804_v44, 0.0 }
  0xf7   : > { %v793_v53 = vadd.f32 %v1365_v47, %v1570_v24  ;;  %v809_v54 = vadd.f32 %v1381_v48, %v1570_v24  ;;  %v570_v55 = vpop.f32.mrf.mxu0  ;;  %v634_v56 = vpop.f32.mrf.mxu1 }
  0xf8   : > { %1304 = vst [vmem:[%s1585_s17 + $0x8] sm:$0xff] %v1232_v49   ;;  %1312 = vst [vmem:[%s1585_s17 + $0x48] sm:$0xff] %v1272_v50   ;;  %v1227_v57 = vpack.c.bf16 %v820_v51, %v819_v45  ;;  %v1267_v58 = vpack.c.bf16 %v836_v52, %v835_v46  ;;  %v791_v59 = vadd.f32 %v1570_v24, %v570_v55 }
  0xf9   : > { %v807_v60 = vadd.f32 %v1570_v24, %v634_v56  ;;  %v1366_v61 = vpop.f32.mrf.mxu0  ;;  %v1382_v62 = vpop.f32.mrf.mxu1  ;;  %v825_v1 = vmax.f32 %v793_v53, 0.0  ;;  %v841_v2 = vmax.f32 %v809_v54, 0.0 }
  0xfa   : > { %1228 = vst [vmem:[%s1585_s17] sm:$0xff] %v1227_v57   ;;  %1311 = vst [vmem:[%s1585_s17 + $0x40] sm:$0xff] %v1267_v58   ;;  %v794_v63 = vadd.f32 %v1366_v61, %v1570_v24  ;;  %v810_v0 = vadd.f32 %v1382_v62, %v1570_v24  ;;  %v823_v9 = vmax.f32 %v791_v59, 0.0 }
  0xfb   : > { %v573_v3 = vpop.f32.mrf.mxu0  ;;  %v637_v4 = vpop.f32.mrf.mxu1  ;;  %v839_v10 = vmax.f32 %v807_v60, 0.0 }
  0xfc   : > { %v826_v5 = vmax.f32 %v794_v63, 0.0  ;;  %v842_v6 = vmax.f32 %v810_v0, 0.0  ;;  %v792_v7 = vadd.f32 %v1570_v24, %v573_v3  ;;  %v808_v8 = vadd.f32 %v1570_v24, %v637_v4 }
  0xfd   : > { %v1369_v11 = vpop.f32.mrf.mxu0  ;;  %v1385_v12 = vpop.f32.mrf.mxu1 }
  0xfe   : > { %v1242_v13 = vpack.c.bf16 %v826_v5, %v825_v1  ;;  %v1282_v14 = vpack.c.bf16 %v842_v6, %v841_v2  ;;  %v824_v15 = vmax.f32 %v792_v7, 0.0  ;;  %v840_v16 = vmax.f32 %v808_v8, 0.0 }
  0xff   : > { %v797_v17 = vadd.f32 %v1369_v11, %v1570_v24  ;;  %v813_v18 = vadd.f32 %v1385_v12, %v1570_v24  ;;  %v586_v19 = vpop.f32.mrf.mxu0  ;;  %v650_v20 = vpop.f32.mrf.mxu1 }
 0x100   : > { %1306 = vst [vmem:[%s1585_s17 + $0x18] sm:$0xff] %v1242_v13   ;;  %1314 = vst [vmem:[%s1585_s17 + $0x58] sm:$0xff] %v1282_v14   ;;  %v1237_v21 = vpack.c.bf16 %v824_v15, %v823_v9  ;;  %v1277_v22 = vpack.c.bf16 %v840_v16, %v839_v10  ;;  %v795_v23 = vadd.f32 %v1570_v24, %v586_v19 }
 0x101   : > { %v811_v25 = vadd.f32 %v1570_v24, %v650_v20  ;;  %v1370_v26 = vpop.f32.mrf.mxu0  ;;  %v1386_v27 = vpop.f32.mrf.mxu1  ;;  %v829_v30 = vmax.f32 %v797_v17, 0.0  ;;  %v845_v31 = vmax.f32 %v813_v18, 0.0 }
 0x102   : > { %1305 = vst [vmem:[%s1585_s17 + $0x10] sm:$0xff] %v1237_v21   ;;  %1313 = vst [vmem:[%s1585_s17 + $0x50] sm:$0xff] %v1277_v22   ;;  %v798_v28 = vadd.f32 %v1370_v26, %v1570_v24  ;;  %v814_v29 = vadd.f32 %v1386_v27, %v1570_v24  ;;  %v827_v38 = vmax.f32 %v795_v23, 0.0 }
 0x103   : > { %v589_v32 = vpop.f32.mrf.mxu0  ;;  %v653_v33 = vpop.f32.mrf.mxu1  ;;  %v843_v39 = vmax.f32 %v811_v25, 0.0 }
 0x104   : > { %v830_v34 = vmax.f32 %v798_v28, 0.0  ;;  %v846_v35 = vmax.f32 %v814_v29, 0.0  ;;  %v796_v36 = vadd.f32 %v1570_v24, %v589_v32  ;;  %v812_v37 = vadd.f32 %v1570_v24, %v653_v33 }
 0x105   : > { %v1373_v40 = vpop.f32.mrf.mxu0  ;;  %v1389_v41 = vpop.f32.mrf.mxu1 }
 0x106   : > { %v1252_v42 = vpack.c.bf16 %v830_v34, %v829_v30  ;;  %v1292_v43 = vpack.c.bf16 %v846_v35, %v845_v31  ;;  %v828_v44 = vmax.f32 %v796_v36, 0.0  ;;  %v844_v45 = vmax.f32 %v812_v37, 0.0 }
 0x107   : > { %v801_v46 = vadd.f32 %v1373_v40, %v1570_v24  ;;  %v817_v47 = vadd.f32 %v1389_v41, %v1570_v24  ;;  %v602_v48 = vpop.f32.mrf.mxu0  ;;  %v666_v49 = vpop.f32.mrf.mxu1 }
 0x108   : > { %1308 = vst [vmem:[%s1585_s17 + $0x28] sm:$0xff] %v1252_v42   ;;  %1316 = vst [vmem:[%s1585_s17 + $0x68] sm:$0xff] %v1292_v43   ;;  %v1247_v50 = vpack.c.bf16 %v828_v44, %v827_v38  ;;  %v1287_v51 = vpack.c.bf16 %v844_v45, %v843_v39  ;;  %v799_v52 = vadd.f32 %v1570_v24, %v602_v48 }
 0x109   : > { %v815_v53 = vadd.f32 %v1570_v24, %v666_v49  ;;  %v1374_v54 = vpop.f32.mrf.mxu0  ;;  %v1390_v55 = vpop.f32.mrf.mxu1  ;;  %v833_v58 = vmax.f32 %v801_v46, 0.0  ;;  %v849_v59 = vmax.f32 %v817_v47, 0.0 }
 0x10a   : > { %1307 = vst [vmem:[%s1585_s17 + $0x20] sm:$0xff] %v1247_v50   ;;  %1315 = vst [vmem:[%s1585_s17 + $0x60] sm:$0xff] %v1287_v51   ;;  %v802_v56 = vadd.f32 %v1374_v54, %v1570_v24  ;;  %v818_v57 = vadd.f32 %v1390_v55, %v1570_v24  ;;  %v831_v2 = vmax.f32 %v799_v52, 0.0 }
 0x10b   : > { %v605_v60 = vpop.f32.mrf.mxu0  ;;  %v669_v61 = vpop.f32.mrf.mxu1  ;;  %v847_v3 = vmax.f32 %v815_v53, 0.0 }
 0x10c   : > { %v834_v62 = vmax.f32 %v802_v56, 0.0  ;;  %v850_v63 = vmax.f32 %v818_v57, 0.0  ;;  %v800_v0 = vadd.f32 %v1570_v24, %v605_v60  ;;  %v816_v1 = vadd.f32 %v1570_v24, %v669_v61 }
 0x10e   : > { %v1262_v4 = vpack.c.bf16 %v834_v62, %v833_v58  ;;  %v1302_v5 = vpack.c.bf16 %v850_v63, %v849_v59  ;;  %v832_v6 = vmax.f32 %v800_v0, 0.0  ;;  %v848_v7 = vmax.f32 %v816_v1, 0.0 }
 0x110   : > { %1310 = vst [vmem:[%s1585_s17 + $0x38] sm:$0xff] %v1262_v4   ;;  %1318 = vst [vmem:[%s1585_s17 + $0x78] sm:$0xff] %v1302_v5   ;;  %v1257_v8 = vpack.c.bf16 %v832_v6, %v831_v2  ;;  %v1297_v9 = vpack.c.bf16 %v848_v7, %v847_v3 }
 0x112   : > { %1309 = vst [vmem:[%s1585_s17 + $0x30] sm:$0xff] %v1257_v8   ;;  %1317 = vst [vmem:[%s1585_s17 + $0x70] sm:$0xff] %v1297_v9  }
 0x113 PF: > { %s13_s14 = sadd.s32 1, %s1477_s14   ;;  %s1640_s12 = smov %s1473_s13 }
 0x114   : > { %p10_p5 = scmp.ge.s32.totalorder %s13_s14, 4   ;;  %s1641_s13 = smov %s1643_s15 }
 0x116   :  { %12 = sbr.rel (!%p10_p5) target bundleno = 2 (0x2), region = 76 }

// kernel: res_block_forward.5
= control target key start
LH: loop header
LB: loop body
LE: loop exit
PB: predicated region body
PF: predicated region fallthrough
CT: control target
= control target key end

     0   :  { %s1192_s12 = smov 0   ;;  %s1194_s13 = smov 0   ;;  %s1324_s0 = inlined_call_operand.vmem [shape: bf16[128,1152], index: 0, kind: input, shape index: {}]   ;;  %s1325_s1 = inlined_call_operand.vmem [shape: bf16[1152,128], index: 1, kind: input, shape index: {}]   ;;  %s1326_s2 = inlined_call_operand.vmem [shape: f32[1,128], index: 2, kind: input, shape index: {}]   ;;  %s1327_s3 = inlined_call_operand.vmem [shape: bf16[128,128], index: 3, kind: output, shape index: {}]  }
   0x1   :  { %s1196_s14 = smov 0   ;;  %s1198_s15 = smov 0  }
   0x2   :  { %s1200_s16 = smov 0  }
   0x3 LB: > { %s25_s17 = sadd.s32 1, %s1165_s15  ;;  %p48_p1 = scmp.ne.s32.totalorder %s1157_s13, %s1153_s12  ;;  %s1169_s16 = sphi %s1200_s16, %s13_s16   ;;  %s1165_s15 = sphi %s1198_s15, %s1331_s15   ;;  %s1161_s14 = sphi %s1196_s14, %s1330_s14   ;;  %s1157_s13 = sphi %s1194_s13, %s1329_s13   ;;  %s1153_s12 = sphi %s1192_s12, %s1328_s12  }
   0x4   : > { %p26_p0 = scmp.ge.s32.totalorder %s25_s17, 9  ;;  %p49_p2 = scmp.eq.s32.totalorder %s1169_s16, 0 }
   0x5   : > { %s41_s19 = sadd.s32 1, %s1157_s13  ;;  %p901_p5 = scmp.ge.s32.totalorder %s1169_s16, 9 }
   0x6   : > { %s1333_s17 = smov (%p26_p0, %s25_s17), 0  ;;  %p50_p3 = por %p49_p2, %p48_p1 }
   0x7   : > { %s37_s18 = ssub.s32 %s1165_s15, %s1333_s17  ;;  %162 = sbr.rel (%p901_p5) target bundleno = 26 (0x1a), region = 20 }
   0x8   : > { %p39_p4 = scmp.eq.s32.totalorder %s37_s18, 0 }
   0xa   : > { %s1227_s20 = scalar_select %p39_p4, %s1157_s13, %s41_s19  }
   0xc   : > { %165 = sbr.rel (!%p50_p3) target bundleno = 26 (0x1a), region = 24  ;;  %s167_s21 = sand.u32 (%p50_p3), 1, %s1157_s13  }
   0xd   : > { %s903_s22 = sshll.u32 (%p50_p3), %s1165_s15, 2  ;;  %s902_s23 = sshll.u32 (%p50_p3), %s167_s21, 6 }
   0xe   : > { %s1235_s26 = scalar_lea.vmem (%p50_p3), %s1324_s0, %s903_s22  ;;  %s169_s27 = scalar_lea.vmem (%p50_p3), [#allocation3], %s902_s23 }
   0xf   : > { %v191_v0 = vld [vmem:[%s1235_s26] sm:$0xf] (%p50_p3)  ;;  %v193_v1 = vld [vmem:[%s1235_s26 + $0x24] sm:$0xf] (%p50_p3)  ;;  %v195_v2 = vld [vmem:[%s1235_s26 + $0x48] sm:$0xf] (%p50_p3) }
  0x10   : > { %192 = vst [vmem:[%s169_s27] sm:$0xf] (%p50_p3), %v191_v0  ;;  %194 = vst [vmem:[%s169_s27 + $0x4] sm:$0xf] (%p50_p3), %v193_v1  ;;  %v197_v3 = vld [vmem:[%s1235_s26 + $0x6c] sm:$0xf] (%p50_p3) }
  0x11   : > { %v199_v4 = vld [vmem:[%s1235_s26 + $0x90] sm:$0xf]  ;;  %196 = vst [vmem:[%s169_s27 + $0x8] sm:$0xf] %v195_v2  ;;  %198 = vst [vmem:[%s169_s27 + $0xc] sm:$0xf] %v197_v3 }
  0x12   : > { %200 = vst [vmem:[%s169_s27 + $0x10] sm:$0xf] %v199_v4  ;;  %v201_v5 = vld [vmem:[%s1235_s26 + $0xb4] sm:$0xf]  ;;  %v203_v6 = vld [vmem:[%s1235_s26 + $0xd8] sm:$0xf] }
  0x13   : > { %v205_v7 = vld [vmem:[%s1235_s26 + $0xfc] sm:$0xf]  ;;  %202 = vst [vmem:[%s169_s27 + $0x14] sm:$0xf] %v201_v5  ;;  %204 = vst [vmem:[%s169_s27 + $0x18] sm:$0xf] %v203_v6 }
  0x14   : > { %206 = vst [vmem:[%s169_s27 + $0x1c] sm:$0xf] %v205_v7  ;;  %v207_v8 = vld [vmem:[%s1235_s26 + $0x120] sm:$0xf]  ;;  %v209_v9 = vld [vmem:[%s1235_s26 + $0x144] sm:$0xf] }
  0x15   : > { %v211_v10 = vld [vmem:[%s1235_s26 + $0x168] sm:$0xf]  ;;  %208 = vst [vmem:[%s169_s27 + $0x20] sm:$0xf] %v207_v8  ;;  %210 = vst [vmem:[%s169_s27 + $0x24] sm:$0xf] %v209_v9 }
  0x16   : > { %212 = vst [vmem:[%s169_s27 + $0x28] sm:$0xf] %v211_v10  ;;  %v213_v11 = vld [vmem:[%s1235_s26 + $0x18c] sm:$0xf]  ;;  %v215_v12 = vld [vmem:[%s1235_s26 + $0x1b0] sm:$0xf] }
  0x17   : > { %v217_v13 = vld [vmem:[%s1235_s26 + $0x1d4] sm:$0xf]  ;;  %214 = vst [vmem:[%s169_s27 + $0x2c] sm:$0xf] %v213_v11  ;;  %216 = vst [vmem:[%s169_s27 + $0x30] sm:$0xf] %v215_v12 }
  0x18   : > { %218 = vst [vmem:[%s169_s27 + $0x34] sm:$0xf] %v217_v13  ;;  %v219_v14 = vld [vmem:[%s1235_s26 + $0x1f8] sm:$0xf]  ;;  %v221_v15 = vld [vmem:[%s1235_s26 + $0x21c] sm:$0xf] }
  0x19   : > { %220 = vst [vmem:[%s169_s27 + $0x38] sm:$0xf] %v219_v14  ;;  %222 = vst [vmem:[%s169_s27 + $0x3c] sm:$0xf] %v221_v15 }
  0x1a PF: > { %p904_p6 = scmp.ge.s32.totalorder %s1169_s16, 1  ;;  %p289_p7 = scmp.lt.s32.totalorder %s1169_s16, 10 }
  0x1c   : > { %p290_p8 = pnand %p904_p6, %p289_p7 }
  0x1d   : > { %s296_s28 = sand.u32 (!%p290_p8), 1, %s1153_s12   ;;  %s906_s29 = sshll.u32 (!%p290_p8), %s1161_s14, 4 }
  0x1e   : > { %293 = sbr.rel (%p290_p8) target bundleno = 308 (0x134), region = 69  ;;  %s905_s30 = sshll.u32 (!%p290_p8), %s296_s28, 6 }
  0x1f   : > { %p335_p9 = scmp.lt.s32.totalorder (!%p290_p8), %s906_s29, 143  ;;  %s1262_s8 = scalar_lea.vmem (!%p290_p8), [#allocation3], %s905_s30 }
  0x20   : > { %p908_p10 = scmp.ne.s32.totalorder (!%p290_p8), %s1161_s14, 0 }
  0x23   : > { %s1335_s29 = smov (!%p335_p9, %s906_s29), 143  ;;  %359 = sbr.rel (%p908_p10) target bundleno = 49 (0x31), region = 77 }
  0x24   : > { %s907_s4 = sshll.u32 %s1335_s29, 2 }
  0x25   : > { %s1260_s7 = scalar_lea.vmem %s1325_s1, %s907_s4 }
  0x28   : > { %v1171_v16 = vmov 0.0  }
  0x29   : > { %360 = vst [vmem:[#allocation2 + $0x30] sm:$0xff] %v1171_v16  ;;  %361 = vst [vmem:[#allocation2] sm:$0xff] %v1171_v16 }
  0x2a   : > { %362 = vst [vmem:[#allocation2 + $0x58] sm:$0xff] %v1171_v16  ;;  %363 = vst [vmem:[#allocation2 + $0x18] sm:$0xff] %v1171_v16 }
  0x2b   : > { %364 = vst [vmem:[#allocation2 + $0x50] sm:$0xff] %v1171_v16  ;;  %365 = vst [vmem:[#allocation2 + $0x68] sm:$0xff] %v1171_v16 }
  0x2c   : > { %366 = vst [vmem:[#allocation2 + $0x8] sm:$0xff] %v1171_v16  ;;  %367 = vst [vmem:[#allocation2 + $0x48] sm:$0xff] %v1171_v16 }
  0x2d   : > { %368 = vst [vmem:[#allocation2 + $0x40] sm:$0xff] %v1171_v16  ;;  %369 = vst [vmem:[#allocation2 + $0x20] sm:$0xff] %v1171_v16 }
  0x2e   : > { %370 = vst [vmem:[#allocation2 + $0x10] sm:$0xff] %v1171_v16  ;;  %371 = vst [vmem:[#allocation2 + $0x38] sm:$0xff] %v1171_v16 }
  0x2f   : > { %372 = vst [vmem:[#allocation2 + $0x60] sm:$0xff] %v1171_v16  ;;  %373 = vst [vmem:[#allocation2 + $0x70] sm:$0xff] %v1171_v16 }
  0x30   : > { %374 = vst [vmem:[#allocation2 + $0x78] sm:$0xff] %v1171_v16  ;;  %375 = vst [vmem:[#allocation2 + $0x28] sm:$0xff] %v1171_v16 }
  0x31 PF: > { %v1115_v17 = vld [vmem:[%s1260_s7 + $0x38] sm:$0xff]   ;;  %v1116_v18 = vld [vmem:[%s1260_s7 + $0x30] sm:$0xff]   ;;  %v1117_v19 = vld [vmem:[%s1260_s7 + $0x28] sm:$0xff]   ;;  %p925_p11 = scmp.ne.s32.totalorder %s1161_s14, 8 }
  0x32   : > { %1026 = vmatprep.subr.bf16.mxu0 %v1115_v17  ;;  %1058 = vmatprep.subr.bf16.mxu1 %v1115_v17  ;;  %v1118_v20 = vld [vmem:[%s1260_s7 + $0x20] sm:$0xff]   ;;  %v1119_v23 = vld [vmem:[%s1260_s7 + $0x18] sm:$0xff]   ;;  %v1120_v24 = vld [vmem:[%s1260_s7 + $0x10] sm:$0xff]  }
  0x33   : > { %1027 = vmatpush3.bf16.msra.mxu0 %v1115_v17  ;;  %1066 = vmatpush3.bf16.msra.mxu1 %v1115_v17  ;;  %v1123_v21 = vld [vmem:[%s1262_s8] sm:$0xff]   ;;  %v1121_v25 = vld [vmem:[%s1260_s7 + $0x8] sm:$0xff]   ;;  %v1127_v29 = vld [vmem:[%s1262_s8 + $0x10] sm:$0xff]  }
  0x34   : > { %1028 = vmatprep.subr.bf16.mxu0 %v1116_v18  ;;  %1059 = vmatprep.subr.bf16.mxu1 %v1116_v18  ;;  %v1124_v22 = vld [vmem:[%s1262_s8 + $0x20] sm:$0xff]   ;;  %v1125_v27 = vld [vmem:[%s1262_s8 + $0x8] sm:$0xff]   ;;  %v1128_v30 = vld [vmem:[%s1262_s8 + $0x30] sm:$0xff]  }
  0x35   : > { %1042 = vmatprep.mubr.bf16.mxu0 %v1123_v21  ;;  %1050 = vmatprep.mubr.bf16.mxu1 %v1124_v22  ;;  %v1122_v26 = vld [vmem:[%s1260_s7] sm:$0xff]   ;;  %v1126_v28 = vld [vmem:[%s1262_s8 + $0x28] sm:$0xff]   ;;  %v1129_v31 = vld [vmem:[%s1262_s8 + $0x18] sm:$0xff]  }
  0x36   : > { %v1130_v32 = vld [vmem:[%s1262_s8 + $0x38] sm:$0xff]   ;;  %v386_v34 = vld [vmem:[#allocation2 + $0x10] sm:$0xff]  ;;  %v384_v38 = vld [vmem:[#allocation2 + $0x40] sm:$0xff] }
  0x37   : > { %1029 = vmatpush3.bf16.msra.mxu0 %v1116_v18  ;;  %1067 = vmatpush3.bf16.msra.mxu1 %v1116_v18  ;;  %v378_v33 = vld [vmem:[#allocation2 + $0x58] sm:$0xff]  ;;  %v376_v37 = vld [vmem:[#allocation2 + $0x30] sm:$0xff]  ;;  %v377_v49 = vld [vmem:[#allocation2] sm:$0xff] }
  0x38   : > { %1030 = vmatprep.subr.bf16.mxu0 %v1117_v19  ;;  %1060 = vmatprep.subr.bf16.mxu1 %v1117_v19  ;;  %v379_v43 = vld [vmem:[#allocation2 + $0x18] sm:$0xff]  ;;  %v385_v50 = vld [vmem:[#allocation2 + $0x20] sm:$0xff]  ;;  %v382_v55 = vld [vmem:[#allocation2 + $0x8] sm:$0xff] }
  0x39   : > { %v387_v44 = vld [vmem:[#allocation2 + $0x38] sm:$0xff]  ;;  %v380_v61 = vld [vmem:[#allocation2 + $0x50] sm:$0xff]  ;;  %v388_v62 = vld [vmem:[#allocation2 + $0x60] sm:$0xff] }
  0x3a   : > { %v390_v56 = vld [vmem:[#allocation2 + $0x78] sm:$0xff]  ;;  %v383_v3 = vld [vmem:[#allocation2 + $0x48] sm:$0xff]  ;;  %v389_v10 = vld [vmem:[#allocation2 + $0x70] sm:$0xff] }
  0x3b   : > { %1031 = vmatpush3.bf16.msra.mxu0 %v1117_v19  ;;  %1068 = vmatpush3.bf16.msra.mxu1 %v1117_v19  ;;  %v391_v4 = vld [vmem:[#allocation2 + $0x28] sm:$0xff] }
  0x3c   : > { %1032 = vmatprep.subr.bf16.mxu0 %v1118_v20  ;;  %1061 = vmatprep.subr.bf16.mxu1 %v1118_v20  ;;  %v381_v9 = vld [vmem:[#allocation2 + $0x68] sm:$0xff] }
  0x3f   : > { %1033 = vmatpush3.bf16.msra.mxu0 %v1118_v20  ;;  %1069 = vmatpush3.bf16.msra.mxu1 %v1118_v20 }
  0x40   : > { %1034 = vmatprep.subr.bf16.mxu0 %v1119_v23  ;;  %1062 = vmatprep.subr.bf16.mxu1 %v1119_v23 }
  0x43   : > { %1035 = vmatpush3.bf16.msra.mxu0 %v1119_v23  ;;  %1070 = vmatpush3.bf16.msra.mxu1 %v1119_v23 }
  0x44   : > { %1036 = vmatprep.subr.bf16.mxu0 %v1120_v24  ;;  %1063 = vmatprep.subr.bf16.mxu1 %v1120_v24 }
  0x47   : > { %1037 = vmatpush3.bf16.msra.mxu0 %v1120_v24  ;;  %1071 = vmatpush3.bf16.msra.mxu1 %v1120_v24 }
  0x48   : > { %1038 = vmatprep.subr.bf16.mxu0 %v1121_v25  ;;  %1064 = vmatprep.subr.bf16.mxu1 %v1121_v25 }
  0x4b   : > { %1039 = vmatpush3.bf16.msra.mxu0 %v1121_v25  ;;  %1072 = vmatpush3.bf16.msra.mxu1 %v1121_v25 }
  0x4c   : > { %1040 = vmatprep.subr.bf16.mxu0 %v1122_v26  ;;  %1065 = vmatprep.subr.bf16.mxu1 %v1122_v26 }
  0x4f   : > { %1041 = vmatpush3.bf16.msra.mxu0 %v1122_v26  ;;  %1073 = vmatpush3.bf16.msra.mxu1 %v1122_v26 }
  0x52   : > { %1043 = vmatmul.mubr.bf16.vlgmr.msra.gmra.mxu0 %v1125_v27  ;;  %1051 = vmatmul.mubr.bf16.vlgmr.msra.gmra.mxu1 %v1126_v28 }
  0x53   : > { %1046 = vmatprep.mubr.bf16.mxu0 %v1127_v29  ;;  %1054 = vmatprep.mubr.bf16.mxu1 %v1128_v30 }
  0x5a   : > { %1047 = vmatmul.mubr.bf16.gmra.mxu0 %v1129_v31  ;;  %1055 = vmatmul.mubr.bf16.gmra.mxu1 %v1130_v32 }
 0x112   : > { %v1044_v35 = vpop.f32.mrf.mxu0  ;;  %v1052_v36 = vpop.f32.mrf.mxu1 }
 0x113   : > { %v619_v39 = vadd.f32 %v1044_v35, %v378_v33  ;;  %v627_v40 = vadd.f32 %v1052_v36, %v386_v34 }
 0x114   : > { %v554_v41 = vpop.f32.mrf.mxu0  ;;  %v586_v42 = vpop.f32.mrf.mxu1 }
 0x115   : > { %635 = vst [vmem:[#allocation2 + $0x58] sm:$0xff] %v619_v39  ;;  %643 = vst [vmem:[#allocation2 + $0x10] sm:$0xff] %v627_v40  ;;  %v617_v45 = vadd.f32 %v554_v41, %v376_v37  ;;  %v625_v46 = vadd.f32 %v586_v42, %v384_v38 }
 0x116   : > { %v1045_v47 = vpop.f32.mrf.mxu0  ;;  %v1053_v48 = vpop.f32.mrf.mxu1 }
 0x117   : > { %633 = vst [vmem:[#allocation2 + $0x30] sm:$0xff] %v617_v45  ;;  %641 = vst [vmem:[#allocation2 + $0x40] sm:$0xff] %v625_v46  ;;  %v620_v51 = vadd.f32 %v1045_v47, %v379_v43  ;;  %v628_v52 = vadd.f32 %v1053_v48, %v387_v44 }
 0x118   : > { %v557_v53 = vpop.f32.mrf.mxu0  ;;  %v589_v54 = vpop.f32.mrf.mxu1 }
 0x119   : > { %636 = vst [vmem:[#allocation2 + $0x18] sm:$0xff] %v620_v51  ;;  %644 = vst [vmem:[#allocation2 + $0x38] sm:$0xff] %v628_v52  ;;  %v618_v57 = vadd.f32 %v557_v53, %v377_v49  ;;  %v626_v58 = vadd.f32 %v589_v54, %v385_v50 }
 0x11a   : > { %v1048_v59 = vpop.f32.mrf.mxu0  ;;  %v1056_v60 = vpop.f32.mrf.mxu1 }
 0x11b   : > { %634 = vst [vmem:[#allocation2] sm:$0xff] %v618_v57  ;;  %642 = vst [vmem:[#allocation2 + $0x20] sm:$0xff] %v626_v58  ;;  %v623_v63 = vadd.f32 %v1048_v59, %v382_v55  ;;  %v631_v0 = vadd.f32 %v1056_v60, %v390_v56 }
 0x11c   : > { %v570_v1 = vpop.f32.mrf.mxu0  ;;  %v602_v2 = vpop.f32.mrf.mxu1 }
 0x11d   : > { %639 = vst [vmem:[#allocation2 + $0x8] sm:$0xff] %v623_v63  ;;  %647 = vst [vmem:[#allocation2 + $0x78] sm:$0xff] %v631_v0  ;;  %v621_v5 = vadd.f32 %v570_v1, %v380_v61  ;;  %v629_v6 = vadd.f32 %v602_v2, %v388_v62 }
 0x11e   : > { %v1049_v7 = vpop.f32.mrf.mxu0  ;;  %v1057_v8 = vpop.f32.mrf.mxu1 }
 0x11f   : > { %637 = vst [vmem:[#allocation2 + $0x50] sm:$0xff] %v621_v5  ;;  %645 = vst [vmem:[#allocation2 + $0x60] sm:$0xff] %v629_v6  ;;  %v624_v11 = vadd.f32 %v1049_v7, %v383_v3  ;;  %v632_v12 = vadd.f32 %v1057_v8, %v391_v4  ;;  %652 = sbr.rel (%p925_p11) target bundleno = 308 (0x134), region = 81 }
 0x120   : > { %v573_v13 = vpop.f32.mrf.mxu0  ;;  %v605_v14 = vpop.f32.mrf.mxu1 }
 0x121   : > { %640 = vst [vmem:[#allocation2 + $0x48] sm:$0xff] %v624_v11  ;;  %648 = vst [vmem:[#allocation2 + $0x28] sm:$0xff] %v632_v12  ;;  %v622_v15 = vadd.f32 %v573_v13, %v381_v9  ;;  %v630_v16 = vadd.f32 %v605_v14, %v389_v10 }
 0x123   : > { %638 = vst [vmem:[#allocation2 + $0x68] sm:$0xff] %v622_v15  ;;  %646 = vst [vmem:[#allocation2 + $0x70] sm:$0xff] %v630_v16 }
 0x124   : > { %v653_v17 = vld [vmem:[#allocation2 + $0x30] sm:$0xff]  ;;  %v654_v18 = vld [vmem:[#allocation2] sm:$0xff]  ;;  %v655_v22 = vld [vmem:[#allocation2 + $0x58] sm:$0xff] }
 0x125   : > { %v926_v19 = vld [vmem:[%s1326_s2] ss:$0 sm:$0xff]  ;;  %v656_v23 = vld [vmem:[#allocation2 + $0x18] sm:$0xff]  ;;  %v659_v29 = vld [vmem:[#allocation2 + $0x8] sm:$0xff] }
 0x126   : > { %v676_v20 = vadd.f32 %v926_v19, %v653_v17  ;;  %v677_v21 = vadd.f32 %v926_v19, %v654_v18  ;;  %v657_v24 = vld [vmem:[#allocation2 + $0x50] sm:$0xff]  ;;  %v678_v25 = vadd.f32 %v926_v19, %v655_v22  ;;  %v679_v26 = vadd.f32 %v926_v19, %v656_v23  ;;  %v661_v35 = vld [vmem:[#allocation2 + $0x40] sm:$0xff]  ;;  %v664_v42 = vld [vmem:[#allocation2 + $0x38] sm:$0xff] }
 0x127   : > { %v680_v28 = vadd.f32 %v926_v19, %v657_v24  ;;  %v682_v34 = vadd.f32 %v926_v19, %v659_v29  ;;  %v662_v36 = vld [vmem:[#allocation2 + $0x20] sm:$0xff]  ;;  %v663_v37 = vld [vmem:[#allocation2 + $0x10] sm:$0xff]  ;;  %v684_v47 = vadd.f32 %v926_v19, %v661_v35  ;;  %v667_v53 = vld [vmem:[#allocation2 + $0x78] sm:$0xff]  ;;  %v687_v57 = vadd.f32 %v926_v19, %v664_v42 }
 0x128   : > { %v660_v30 = vld [vmem:[#allocation2 + $0x48] sm:$0xff]  ;;  %v692_v31 = vmax.f32 %v676_v20, 0.0  ;;  %v693_v32 = vmax.f32 %v677_v21, 0.0  ;;  %v694_v38 = vmax.f32 %v678_v25, 0.0  ;;  %v695_v39 = vmax.f32 %v679_v26, 0.0  ;;  %v665_v43 = vld [vmem:[#allocation2 + $0x60] sm:$0xff] }
 0x129   : > { %v696_v40 = vmax.f32 %v680_v28, 0.0  ;;  %v683_v41 = vadd.f32 %v926_v19, %v660_v30  ;;  %v698_v46 = vmax.f32 %v682_v34, 0.0  ;;  %v685_v51 = vadd.f32 %v926_v19, %v662_v36  ;;  %v668_v54 = vld [vmem:[#allocation2 + $0x28] sm:$0xff] }
 0x12a   : > { %v658_v27 = vld [vmem:[#allocation2 + $0x68] sm:$0xff]  ;;  %v966_v44 = vpack.c.bf16 %v693_v32, %v692_v31  ;;  %v666_v48 = vld [vmem:[#allocation2 + $0x70] sm:$0xff]  ;;  %v971_v49 = vpack.c.bf16 %v695_v39, %v694_v38  ;;  %v686_v52 = vadd.f32 %v926_v19, %v663_v37  ;;  %v700_v56 = vmax.f32 %v684_v47, 0.0 }
 0x12b   : > { %v681_v33 = vadd.f32 %v926_v19, %v658_v27  ;;  %v699_v50 = vmax.f32 %v683_v41, 0.0  ;;  %v688_v58 = vadd.f32 %v926_v19, %v665_v43  ;;  %v701_v60 = vmax.f32 %v685_v51, 0.0 }
 0x12c   : > { %967 = vst [vmem:[%s1327_s3] sm:$0xff] %v966_v44   ;;  %1003 = vst [vmem:[%s1327_s3 + $0x8] sm:$0xff] %v971_v49   ;;  %v702_v61 = vmax.f32 %v686_v52, 0.0  ;;  %v689_v62 = vadd.f32 %v926_v19, %v666_v48  ;;  %v703_v63 = vmax.f32 %v687_v57, 0.0  ;;  %v690_v1 = vadd.f32 %v926_v19, %v667_v53 }
 0x12d   : > { %v697_v45 = vmax.f32 %v681_v33, 0.0  ;;  %v981_v59 = vpack.c.bf16 %v699_v50, %v698_v46  ;;  %v704_v0 = vmax.f32 %v688_v58, 0.0  ;;  %v691_v2 = vadd.f32 %v926_v19, %v668_v54 }
 0x12e   : > { %v986_v3 = vpack.c.bf16 %v701_v60, %v700_v56  ;;  %v705_v4 = vmax.f32 %v689_v62, 0.0  ;;  %v991_v5 = vpack.c.bf16 %v703_v63, %v702_v61  ;;  %v706_v6 = vmax.f32 %v690_v1, 0.0 }
 0x12f   : > { %v976_v55 = vpack.c.bf16 %v697_v45, %v696_v40  ;;  %1005 = vst [vmem:[%s1327_s3 + $0x18] sm:$0xff] %v981_v59   ;;  %v707_v7 = vmax.f32 %v691_v2, 0.0 }
 0x130   : > { %1006 = vst [vmem:[%s1327_s3 + $0x20] sm:$0xff] %v986_v3   ;;  %v996_v8 = vpack.c.bf16 %v705_v4, %v704_v0  ;;  %1007 = vst [vmem:[%s1327_s3 + $0x28] sm:$0xff] %v991_v5  }
 0x131   : > { %1004 = vst [vmem:[%s1327_s3 + $0x10] sm:$0xff] %v976_v55   ;;  %v1001_v9 = vpack.c.bf16 %v707_v7, %v706_v6 }
 0x132   : > { %1008 = vst [vmem:[%s1327_s3 + $0x30] sm:$0xff] %v996_v8  }
 0x133   : > { %1009 = vst [vmem:[%s1327_s3 + $0x38] sm:$0xff] %v1001_v9  }
 0x134 PF: > { %s13_s16 = sadd.s32 1, %s1169_s16   ;;  %s1328_s12 = smov %s1157_s13 }
 0x135   : > { %p10_p12 = scmp.ge.s32.totalorder %s13_s16, 11   ;;  %s1329_s13 = smov %s1227_s20 }
 0x136   : > { %s1330_s14 = smov %s1165_s15  ;;  %s1331_s15 = smov %s1333_s17 }
 0x137   :  { %12 = sbr.rel (!%p10_p12) target bundleno = 3 (0x3), region = 122 }

// kernel: res_block_forward.7
= control target key start
LH: loop header
LB: loop body
LE: loop exit
PB: predicated region body
PF: predicated region fallthrough
CT: control target
= control target key end

     0   :  { %s708_s1 = inlined_call_operand.vmem [shape: bf16[128,128], index: 1, kind: input, shape index: {}]   ;;  %s709_s0 = inlined_call_operand.vmem [shape: bf16[128,128], index: 0, kind: input, shape index: {}]   ;;  %s710_s2 = inlined_call_operand.vmem [shape: f32[1,128], index: 2, kind: input, shape index: {}]   ;;  %s711_s3 = inlined_call_operand.vmem [shape: f32[128,128], index: 3, kind: input, shape index: {}]   ;;  %s712_s4 = inlined_call_operand.vmem [shape: f32[128,128], index: 4, kind: output, shape index: {}]  }
   0x1   :  { %v502_v0 = vld [vmem:[%s708_s1 + $0x38] sm:$0xff]   ;;  %v503_v1 = vld [vmem:[%s708_s1 + $0x30] sm:$0xff]   ;;  %v504_v2 = vld [vmem:[%s708_s1 + $0x28] sm:$0xff]  }
   0x2   :  { %454 = vmatprep.subr.bf16.mxu0 %v502_v0  ;;  %486 = vmatprep.subr.bf16.mxu1 %v502_v0  ;;  %v505_v3 = vld [vmem:[%s708_s1 + $0x20] sm:$0xff]   ;;  %v506_v6 = vld [vmem:[%s708_s1 + $0x18] sm:$0xff]   ;;  %v507_v7 = vld [vmem:[%s708_s1 + $0x10] sm:$0xff]  }
   0x3   :  { %455 = vmatpush3.bf16.msra.mxu0 %v502_v0  ;;  %494 = vmatpush3.bf16.msra.mxu1 %v502_v0  ;;  %v510_v4 = vld [vmem:[%s709_s0] sm:$0xff]   ;;  %v508_v8 = vld [vmem:[%s708_s1 + $0x8] sm:$0xff]   ;;  %v514_v12 = vld [vmem:[%s709_s0 + $0x10] sm:$0xff]  }
   0x4   :  { %456 = vmatprep.subr.bf16.mxu0 %v503_v1  ;;  %487 = vmatprep.subr.bf16.mxu1 %v503_v1  ;;  %v511_v5 = vld [vmem:[%s709_s0 + $0x20] sm:$0xff]   ;;  %v512_v10 = vld [vmem:[%s709_s0 + $0x8] sm:$0xff]   ;;  %v515_v13 = vld [vmem:[%s709_s0 + $0x30] sm:$0xff]  }
   0x5   :  { %470 = vmatprep.mubr.bf16.mxu0 %v510_v4  ;;  %478 = vmatprep.mubr.bf16.mxu1 %v511_v5  ;;  %v509_v9 = vld [vmem:[%s708_s1] sm:$0xff]   ;;  %v513_v11 = vld [vmem:[%s709_s0 + $0x28] sm:$0xff]   ;;  %v516_v14 = vld [vmem:[%s709_s0 + $0x18] sm:$0xff]  }
   0x6   :  { %v517_v15 = vld [vmem:[%s709_s0 + $0x38] sm:$0xff]   ;;  %v594_v16 = vld [vmem:[%s710_s2] ss:$0 sm:$0xff]  ;;  %v355_v18 = vld [vmem:[%s711_s3 + $0x10] sm:$0xff] }
   0x7   :  { %457 = vmatpush3.bf16.msra.mxu0 %v503_v1  ;;  %495 = vmatpush3.bf16.msra.mxu1 %v503_v1  ;;  %v363_v20 = vld [vmem:[%s711_s3 + $0x50] sm:$0xff]  ;;  %v353_v24 = vld [vmem:[%s711_s3] sm:$0xff]  ;;  %v356_v37 = vld [vmem:[%s711_s3 + $0x18] sm:$0xff] }
   0x8   :  { %458 = vmatprep.subr.bf16.mxu0 %v504_v2  ;;  %488 = vmatprep.subr.bf16.mxu1 %v504_v2  ;;  %v361_v26 = vld [vmem:[%s711_s3 + $0x40] sm:$0xff]  ;;  %v364_v38 = vld [vmem:[%s711_s3 + $0x58] sm:$0xff]  ;;  %v354_v42 = vld [vmem:[%s711_s3 + $0x8] sm:$0xff] }
   0x9   :  { %v362_v44 = vld [vmem:[%s711_s3 + $0x48] sm:$0xff]  ;;  %v359_v52 = vld [vmem:[%s711_s3 + $0x30] sm:$0xff]  ;;  %v365_v4 = vld [vmem:[%s711_s3 + $0x60] sm:$0xff] }
   0xa   :  { %v367_v54 = vld [vmem:[%s711_s3 + $0x70] sm:$0xff] }
   0xb   :  { %459 = vmatpush3.bf16.msra.mxu0 %v504_v2  ;;  %496 = vmatpush3.bf16.msra.mxu1 %v504_v2 }
   0xc   :  { %460 = vmatprep.subr.bf16.mxu0 %v505_v3  ;;  %489 = vmatprep.subr.bf16.mxu1 %v505_v3 }
   0xf   :  { %461 = vmatpush3.bf16.msra.mxu0 %v505_v3  ;;  %497 = vmatpush3.bf16.msra.mxu1 %v505_v3  ;;  %v357_v3 = vld [vmem:[%s711_s3 + $0x20] sm:$0xff] }
  0x10   :  { %462 = vmatprep.subr.bf16.mxu0 %v506_v6  ;;  %490 = vmatprep.subr.bf16.mxu1 %v506_v6 }
  0x13   :  { %463 = vmatpush3.bf16.msra.mxu0 %v506_v6  ;;  %498 = vmatpush3.bf16.msra.mxu1 %v506_v6 }
  0x14   :  { %464 = vmatprep.subr.bf16.mxu0 %v507_v7  ;;  %491 = vmatprep.subr.bf16.mxu1 %v507_v7 }
  0x17   :  { %465 = vmatpush3.bf16.msra.mxu0 %v507_v7  ;;  %499 = vmatpush3.bf16.msra.mxu1 %v507_v7 }
  0x18   :  { %466 = vmatprep.subr.bf16.mxu0 %v508_v8  ;;  %492 = vmatprep.subr.bf16.mxu1 %v508_v8 }
  0x1b   :  { %467 = vmatpush3.bf16.msra.mxu0 %v508_v8  ;;  %500 = vmatpush3.bf16.msra.mxu1 %v508_v8  ;;  %v360_v8 = vld [vmem:[%s711_s3 + $0x38] sm:$0xff] }
  0x1c   :  { %468 = vmatprep.subr.bf16.mxu0 %v509_v9  ;;  %493 = vmatprep.subr.bf16.mxu1 %v509_v9 }
  0x1f   :  { %469 = vmatpush3.bf16.msra.mxu0 %v509_v9  ;;  %501 = vmatpush3.bf16.msra.mxu1 %v509_v9 }
  0x22   :  { %471 = vmatmul.mubr.bf16.vlgmr.msra.gmra.mxu0 %v512_v10  ;;  %479 = vmatmul.mubr.bf16.vlgmr.msra.gmra.mxu1 %v513_v11  ;;  %v368_v10 = vld [vmem:[%s711_s3 + $0x78] sm:$0xff] }
  0x23   :  { %474 = vmatprep.mubr.bf16.mxu0 %v514_v12  ;;  %482 = vmatprep.mubr.bf16.mxu1 %v515_v13 }
  0x2a   :  { %475 = vmatmul.mubr.bf16.gmra.mxu0 %v516_v14  ;;  %483 = vmatmul.mubr.bf16.gmra.mxu1 %v517_v15 }
  0xe2   :  { %v472_v17 = vpop.f32.mrf.mxu0  ;;  %v480_v19 = vpop.f32.mrf.mxu1 }
  0xe3   :  { %v339_v21 = vadd.f32 %v472_v17, %v594_v16  ;;  %v347_v22 = vadd.f32 %v480_v19, %v594_v16  ;;  %v358_v19 = vld [vmem:[%s711_s3 + $0x28] sm:$0xff] }
  0xe4   :  { %v216_v23 = vpop.f32.mrf.mxu0  ;;  %v248_v25 = vpop.f32.mrf.mxu1 }
  0xe5   :  { %v371_v27 = vadd.f32 %v355_v18, %v339_v21  ;;  %v379_v28 = vadd.f32 %v363_v20, %v347_v22  ;;  %v337_v29 = vadd.f32 %v594_v16, %v216_v23  ;;  %v345_v30 = vadd.f32 %v594_v16, %v248_v25  ;;  %v366_v21 = vld [vmem:[%s711_s3 + $0x68] sm:$0xff] }
  0xe6   :  { %v473_v31 = vpop.f32.mrf.mxu0  ;;  %v481_v32 = vpop.f32.mrf.mxu1 }
  0xe7   :  { %v387_v33 = vmax.f32 %v371_v27, 0.0  ;;  %v395_v34 = vmax.f32 %v379_v28, 0.0  ;;  %v369_v35 = vadd.f32 %v353_v24, %v337_v29  ;;  %v377_v36 = vadd.f32 %v361_v26, %v345_v30 }
  0xe8   :  { %v340_v39 = vadd.f32 %v473_v31, %v594_v16  ;;  %v348_v40 = vadd.f32 %v481_v32, %v594_v16  ;;  %v219_v41 = vpop.f32.mrf.mxu0  ;;  %v251_v43 = vpop.f32.mrf.mxu1 }
  0xe9   :  { %403 = vst [vmem:[%s712_s4 + $0x10] sm:$0xff] %v387_v33  ;;  %411 = vst [vmem:[%s712_s4 + $0x50] sm:$0xff] %v395_v34  ;;  %v385_v45 = vmax.f32 %v369_v35, 0.0  ;;  %v393_v46 = vmax.f32 %v377_v36, 0.0  ;;  %v338_v47 = vadd.f32 %v594_v16, %v219_v41  ;;  %v346_v48 = vadd.f32 %v594_v16, %v251_v43 }
  0xea   :  { %v372_v49 = vadd.f32 %v356_v37, %v340_v39  ;;  %v380_v50 = vadd.f32 %v364_v38, %v348_v40  ;;  %v476_v51 = vpop.f32.mrf.mxu0  ;;  %v484_v53 = vpop.f32.mrf.mxu1 }
  0xeb   :  { %401 = vst [vmem:[%s712_s4] sm:$0xff] %v385_v45  ;;  %409 = vst [vmem:[%s712_s4 + $0x40] sm:$0xff] %v393_v46  ;;  %v370_v55 = vadd.f32 %v354_v42, %v338_v47  ;;  %v378_v56 = vadd.f32 %v362_v44, %v346_v48  ;;  %v343_v57 = vadd.f32 %v476_v51, %v594_v16 }
  0xec   :  { %v351_v58 = vadd.f32 %v484_v53, %v594_v16  ;;  %v388_v59 = vmax.f32 %v372_v49, 0.0  ;;  %v396_v60 = vmax.f32 %v380_v50, 0.0  ;;  %v232_v61 = vpop.f32.mrf.mxu0  ;;  %v264_v62 = vpop.f32.mrf.mxu1 }
  0xed   :  { %v386_v63 = vmax.f32 %v370_v55, 0.0  ;;  %v394_v0 = vmax.f32 %v378_v56, 0.0  ;;  %v375_v1 = vadd.f32 %v359_v52, %v343_v57  ;;  %v341_v5 = vadd.f32 %v594_v16, %v232_v61 }
  0xee   :  { %v383_v2 = vadd.f32 %v367_v54, %v351_v58  ;;  %404 = vst [vmem:[%s712_s4 + $0x18] sm:$0xff] %v388_v59  ;;  %412 = vst [vmem:[%s712_s4 + $0x58] sm:$0xff] %v396_v60  ;;  %v349_v6 = vadd.f32 %v594_v16, %v264_v62  ;;  %v477_v7 = vpop.f32.mrf.mxu0  ;;  %v485_v9 = vpop.f32.mrf.mxu1 }
  0xef   :  { %402 = vst [vmem:[%s712_s4 + $0x8] sm:$0xff] %v386_v63  ;;  %410 = vst [vmem:[%s712_s4 + $0x48] sm:$0xff] %v394_v0  ;;  %v391_v11 = vmax.f32 %v375_v1, 0.0  ;;  %v344_v13 = vadd.f32 %v477_v7, %v594_v16  ;;  %v352_v14 = vadd.f32 %v485_v9, %v594_v16  ;;  %v373_v15 = vadd.f32 %v357_v3, %v341_v5 }
  0xf0   :  { %v399_v12 = vmax.f32 %v383_v2, 0.0  ;;  %v381_v17 = vadd.f32 %v365_v4, %v349_v6  ;;  %v235_v18 = vpop.f32.mrf.mxu0  ;;  %v267_v20 = vpop.f32.mrf.mxu1 }
  0xf1   :  { %407 = vst [vmem:[%s712_s4 + $0x30] sm:$0xff] %v391_v11  ;;  %v376_v22 = vadd.f32 %v360_v8, %v344_v13  ;;  %v384_v23 = vadd.f32 %v368_v10, %v352_v14  ;;  %v342_v24 = vadd.f32 %v594_v16, %v235_v18  ;;  %v350_v25 = vadd.f32 %v594_v16, %v267_v20 }
  0xf2   :  { %415 = vst [vmem:[%s712_s4 + $0x70] sm:$0xff] %v399_v12  ;;  %v389_v26 = vmax.f32 %v373_v15, 0.0  ;;  %v397_v27 = vmax.f32 %v381_v17, 0.0 }
  0xf3   :  { %v392_v28 = vmax.f32 %v376_v22, 0.0  ;;  %v400_v29 = vmax.f32 %v384_v23, 0.0  ;;  %v374_v30 = vadd.f32 %v358_v19, %v342_v24  ;;  %v382_v31 = vadd.f32 %v366_v21, %v350_v25 }
  0xf4   :  { %405 = vst [vmem:[%s712_s4 + $0x20] sm:$0xff] %v389_v26  ;;  %413 = vst [vmem:[%s712_s4 + $0x60] sm:$0xff] %v397_v27 }
  0xf5   :  { %408 = vst [vmem:[%s712_s4 + $0x38] sm:$0xff] %v392_v28  ;;  %416 = vst [vmem:[%s712_s4 + $0x78] sm:$0xff] %v400_v29  ;;  %v390_v16 = vmax.f32 %v374_v30, 0.0  ;;  %v398_v32 = vmax.f32 %v382_v31, 0.0 }
  0xf7   :  { %406 = vst [vmem:[%s712_s4 + $0x28] sm:$0xff] %v390_v16  ;;  %414 = vst [vmem:[%s712_s4 + $0x68] sm:$0xff] %v398_v32 }

</bundles_post_ra>
